<compile_context>
chip_gen: v7x
topology: tpu7x:2x2x1
jax: 0.10.0
libtpu: 0.0.40
codegen_flags: <defaults>
</compile_context>

<pallas_src>
import jax
import jax.numpy as jnp
import numpy as np
from jax import lax
from jax.experimental import pallas as pl
from jax.experimental.pallas import tpu as pltpu

INV_SQRT2 = 0.7071067811865476

# Problem constants (fixed by the module and its input x1 = randn(1, 2, 8, 8)).
CI1, CH, CO2 = 2, 4, 4      # conv1 in-ch, conv1 out-ch (= conv2 in-ch), conv2 out-ch
K1, K2 = 3, 2
H = W = 8                   # input spatial size
OH1 = 2 * H + 1             # 17  (v1 spatial)
OH2 = 4 * H                 # 32  (v2 spatial)


def _erf_approx(x):
    """Abramowitz & Stegun 7.1.26 erf (|abs err| < 1.5e-7).

    exp and the (Newton-refined) approximate reciprocal run on the EUP slot,
    keeping the VALU free for the conv fmas.
    """
    a1, a2, a3, a4, a5, q = (0.254829592, -0.284496736, 1.421413741,
                             -1.453152027, 1.061405429, 0.3275911)
    ax = jnp.abs(x)
    d = 1.0 + q * ax
    t = pl.reciprocal(d, approx=True)
    t = t * (2.0 - d * t)                       # one Newton step -> ~f32 accuracy
    poly = ((((a5 * t + a4) * t + a3) * t + a2) * t + a1) * t
    sgn = jnp.where(x >= 0, 1.0, -1.0)
    return sgn * (1.0 - poly * jnp.exp(-ax * ax))


def _fused_kernel(xd_ref, w1p_ref, b1p_ref, w2p_ref, b2p_ref, v2_ref, e_ref):
    # ------------------------- conv-transpose #1 ---------------------------
    # xd_ref[0, ci] : (8,128) width-dilated input, tiled over 4 ch blocks:
    #   xd[ci][i, ch*32 + 2b] = x[ci, i, b], all other lanes 0.
    # Lane-rolled taps kw = 0,1,2 (roll moves data to higher lanes: out[l] = in[l-kw]).
    xs = []
    for ci in range(CI1):
        base = xd_ref[0, ci]                                        # (8,128)
        xs.append([base,
                   pltpu.roll(base, shift=1, axis=1),
                   pltpu.roll(base, shift=2, axis=1)])

    # T[kh][i, ch*32 + ow] = sum_{ci,kw} w1[ci,ch,kh,kw] * x[ci, i, (ow-kw)/2]
    # (dilated input makes the even/odd tap parity automatic).
    T = []
    for kh in range(K1):
        acc = None
        for ci in range(CI1):
            for kw in range(K1):
                term = w1p_ref[kh, ci, kw] * xs[ci][kw]
                acc = term if acc is None else acc + term
        T.append(acc)

    b1s = b1p_ref[...]                                              # (8,128)
    zrow = jnp.zeros((1, 128), jnp.float32)

    # v1 row-phase slabs, lane = ch*32 + column (cols 17..31 of a block unused).
    t2_dn = jnp.concatenate([zrow, T[2][0:7, :]], axis=0)           # T2 shifted down 1 row
    p0_lo = T[0] + t2_dn + b1s                  # v1 rows 0,2,...,14   (8,128)
    p0_hi = T[2][7:8, :] + b1s[0:1, :]          # v1 row 16            (1,128)
    p1 = T[1] + b1s                             # v1 rows 1,3,...,15   (8,128)

    # ------------- fused epilogue:  v6 = 0.5*v1 + 1,  v5 = erf(v1/sqrt2) ----
    # e_ref slots: [v6 rows-even, v6 rows-odd, v5 rows-even, v5 rows-odd]
    e_ref[0, 0, 0:8] = p0_lo * 0.5 + 1.0
    e_ref[0, 0, 8:9] = p0_hi * 0.5 + 1.0
    e_ref[0, 1, 0:8] = p1 * 0.5 + 1.0
    e_ref[0, 1, 8:9] = zrow                     # filler row (cropped by wrapper)
    e_ref[0, 2, 0:8] = _erf_approx(p0_lo * INV_SQRT2)
    e_ref[0, 2, 8:9] = _erf_approx(p0_hi * INV_SQRT2)
    e_ref[0, 3, 0:8] = _erf_approx(p1 * INV_SQRT2)
    e_ref[0, 3, 8:9] = zrow                     # filler row (cropped by wrapper)

    # ------------------------- conv-transpose #2 ---------------------------
    # Output packed as v2p[rs][u, co*32 + dc*16 + j] = v2[co, 4u+rs, 2j+dc].
    # Each output pixel has exactly one (kh,kw) tap; per rs the source is one
    # 8-row slice of one v1 row-phase slab.
    lane = lax.broadcasted_iota(jnp.int32, (8, 128), 1)
    low_half = (lane % 32) < 16                 # dc = 0 half of each 32-block

    def gathered(s):
        # g[u, ch*32 + dc*16 + j] = v1[ch, row_u, j + dc]
        return jnp.where(low_half, s, pltpu.roll(s, shift=15, axis=1))

    g_a = gathered(p0_lo)                                            # rs = 0
    g_b = gathered(p1)                                               # rs = 1, 2
    g_c = gathered(jnp.concatenate([p0_lo[1:8, :], p0_hi], axis=0))  # rs = 3

    b2s = b2p_ref[...]
    # ch -> co contraction: rotate the ch blocks by 32*d lanes; block co then
    # holds ch = (co-d)%4, matched by the pre-packed weight slab w2p[rs, d].
    for g, rs_list in ((g_a, (0,)), (g_b, (1, 2)), (g_c, (3,))):
        accs = [b2s for _ in rs_list]
        for d in range(4):
            r = g if d == 0 else pltpu.roll(g, shift=32 * d, axis=1)
            for i, rs in enumerate(rs_list):
                accs[i] = accs[i] + w2p_ref[rs, d] * r
        for i, rs in enumerate(rs_list):
            v2_ref[0, rs] = accs[i]             # unmasked full-vreg store


def model_forward(x, params):
    """Single fused Pallas kernel; returns (v2, v6, v5) in NCHW.

    TODO(synk): the reference torch forward computes v7 = v2 * v6, but
    (N,4,32,32) and (N,4,17,17) are not broadcast-compatible so PyTorch
    raises; we return the well-defined operands (plus v5) instead of faking v7.
    """
    w1, b1, w2, b2 = params
    N = x.shape[0]
    assert x.shape[1:] == (CI1, H, W)
    f32 = jnp.float32
    x = x.astype(f32)
    w1, b1, w2, b2 = (w1.astype(f32), b1.astype(f32), w2.astype(f32), b2.astype(f32))

    # ---- input layout prep (pure layout, zero arithmetic) -------------------
    # xd[n, ci, i, ch*32 + 2b] = x[n, ci, i, b]; other lanes 0; tiled over the
    # 4 output-channel blocks so every kernel fma is a full 128-lane vreg.
    xz = jnp.stack([x, jnp.zeros_like(x)], axis=-1).reshape(N, CI1, H, 2 * W)
    xz = jnp.pad(xz, ((0, 0), (0, 0), (0, 0), (0, 32 - 2 * W)))
    xd = jnp.tile(xz, (1, 1, 1, CH))                                 # (N,2,8,128)

    # ---- weight / bias pre-packing into lane-dense VMEM slabs ---------------
    # w1p[kh, ci, kw, :, ch*32 + m] = w1[ci, ch, kh, kw]
    w1t = jnp.transpose(w1, (2, 0, 3, 1))                            # (kh,ci,kw,ch)
    w1p = jnp.broadcast_to(w1t[:, :, :, None, :, None],
                           (K1, CI1, K1, 8, CH, 32)).reshape(K1, CI1, K1, 8, 128)
    b1p = jnp.broadcast_to(b1[None, :, None], (8, CH, 32)).reshape(8, 128)

    # w2p[rs, d, :, co*32 + dc*16 + j] = w2[(co-d)%4, co, kh(rs), 1-dc]
    kh_of_rs = jnp.array([1, 0, 1, 0], dtype=jnp.int32)
    rs_i = jnp.arange(4)[:, None, None, None]
    d_i = jnp.arange(4)[None, :, None, None]
    co_i = jnp.arange(4)[None, None, :, None]
    dc_i = jnp.arange(2)[None, None, None, :]
    wg = w2[(co_i - d_i) % 4, co_i, kh_of_rs[rs_i], 1 - dc_i]        # (4,4,4,2)
    w2p = jnp.broadcast_to(wg[:, :, None, :, :, None],
                           (4, 4, 8, CO2, 2, 16)).reshape(4, 4, 8, 128)
    b2p = jnp.broadcast_to(b2[None, :, None], (8, CO2, 32)).reshape(8, 128)

    flops = int(N * (2 * CI1 * CH * K1 * K1 * H * W          # conv1 MAC*2
                     + 2 * CH * CO2 * OH2 * OH2              # conv2 MAC*2
                     + 20 * CH * OH1 * OH1))                 # epilogue
    cost = pl.CostEstimate(flops=flops,
                           transcendentals=int(2 * N * CH * OH1 * OH1),
                           bytes_accessed=int(xd.size * 4 + w1p.size * 4
                                              + w2p.size * 4 + b1p.size * 4
                                              + b2p.size * 4
                                              + N * (4 * 8 + 4 * 9) * 128 * 4))

    out_shape = (
        jax.ShapeDtypeStruct((N, 4, 8, 128), f32),    # v2, lane-packed
        jax.ShapeDtypeStruct((N, 4, 9, 128), f32),    # [v6_r0, v6_r1, v5_r0, v5_r1]
    )
    v2p, ep = pl.pallas_call(
        _fused_kernel,
        out_shape=out_shape,
        grid=(N,),
        in_specs=[
            pl.BlockSpec((1, CI1, H, 128), lambda n: (n, 0, 0, 0)),
            pl.BlockSpec((K1, CI1, K1, 8, 128), lambda n: (0, 0, 0, 0, 0)),
            pl.BlockSpec((8, 128), lambda n: (0, 0)),
            pl.BlockSpec((4, 4, 8, 128), lambda n: (0, 0, 0, 0)),
            pl.BlockSpec((8, 128), lambda n: (0, 0)),
        ],
        out_specs=(
            pl.BlockSpec((1, 4, 8, 128), lambda n: (n, 0, 0, 0)),
            pl.BlockSpec((1, 4, 9, 128), lambda n: (n, 0, 0, 0)),
        ),
        compiler_params=pltpu.CompilerParams(
            dimension_semantics=("parallel",)),       # batch shards across TCs on v7x
        cost_estimate=cost,
    )(xd, w1p, b1p, w2p, b2p)

    # ---- pure-layout unpack (reshape / transpose / crop only) ---------------
    # v2p[n, rs, u, co*32 + dc*16 + j] -> v2[n, co, 4u+rs, 2j+dc]
    v2 = (v2p.reshape(N, 4, 8, CO2, 2, 16)
             .transpose(0, 3, 2, 1, 5, 4)
             .reshape(N, CO2, OH2, OH2))

    # ep[n, f*2 + r, a, ch*32 + iw] -> {v6,v5}[n, ch, 2a+r, iw]
    e = (ep.reshape(N, 2, 2, 9, CH, 32)
           .transpose(0, 1, 4, 3, 2, 5)
           .reshape(N, 2, CH, 18, 32)[:, :, :, :OH1, :OH1])
    v6 = e[:, 0]
    v5 = e[:, 1]
    return v2, v6, v5


def init_params(key):
    k1, k2, k3, k4 = jax.random.split(key, 4)
    w1 = jax.random.normal(k1, (CI1, CH, K1, K1), jnp.float32) * 0.1   # torch layout
    b1 = jax.random.normal(k2, (CH,), jnp.float32) * 0.1
    w2 = jax.random.normal(k3, (CH, CO2, K2, K2), jnp.float32) * 0.1
    b2 = jax.random.normal(k4, (CO2,), jnp.float32) * 0.1
    return w1, b1, w2, b2


def _ref_conv_transpose2d(x, w, b, s, p):
    K = w.shape[2]
    wf = jnp.flip(w, axis=(2, 3)).transpose(1, 0, 2, 3)               # (CO,CI,KH,KW)
    y = lax.conv_general_dilated(
        x, wf, window_strides=(1, 1),
        padding=[(K - 1 - p, K - 1 - p)] * 2,
        lhs_dilation=(s, s),
        dimension_numbers=("NCHW", "OIHW", "NCHW"))
    return y + b[None, :, None, None]


if __name__ == "__main__":
    key = jax.random.PRNGKey(0)
    kx, kp = jax.random.split(key)
    N = 2
    x = jax.random.normal(kx, (N, CI1, H, W), jnp.float32)            # torch.randn(·,2,8,8)
    params = init_params(kp)

    fwd = jax.jit(model_forward)
    v2, v6, v5 = fwd(x, params)
    jax.block_until_ready((v2, v6, v5))

    # ---- cross-check against XLA references ---------------------------------
    w1, b1, w2, b2 = params
    r1 = _ref_conv_transpose2d(x, w1, b1, 2, 0)                       # v1 (N,4,17,17)
    r2 = _ref_conv_transpose2d(r1, w2, b2, 2, 1)                      # v2 (N,4,32,32)
    r6 = r1 * 0.5 + 1.0
    r5 = lax.erf(r1 * INV_SQRT2)

    assert v2.shape == (N, CO2, OH2, OH2)
    assert v6.shape == (N, CH, OH1, OH1) and v5.shape == (N, CH, OH1, OH1)
    assert np.allclose(np.asarray(v2), np.asarray(r2), rtol=1e-4, atol=1e-4)
    assert np.allclose(np.asarray(v6), np.asarray(r6), rtol=1e-5, atol=1e-5)
    assert np.allclose(np.asarray(v5), np.asarray(r5), rtol=1e-4, atol=1e-4)

    print("KERNEL_OK")
</pallas_src>

<mosaic_0001>
module attributes {stable_mosaic.version = 11 : i64} {
  func.func @_fused_kernel(%arg0: i32, %arg1: memref<1x2x8x128xf32, #tpu.memory_space<vmem>>, %arg2: memref<3x2x3x8x128xf32, #tpu.memory_space<vmem>>, %arg3: memref<8x128xf32, #tpu.memory_space<vmem>>, %arg4: memref<4x4x8x128xf32, #tpu.memory_space<vmem>>, %arg5: memref<8x128xf32, #tpu.memory_space<vmem>>, %arg6: memref<1x4x8x128xf32, #tpu.memory_space<vmem>>, %arg7: memref<1x4x9x128xf32, #tpu.memory_space<vmem>>) attributes {dimension_semantics = [#tpu.dimension_semantics<parallel>], iteration_bounds = array<i64: 2>, scalar_prefetch = 0 : i64, scratch_operands = 0 : i64, tpu.core_type = #tpu.core_type<tc>, window_params = [{transform_indices = @transform_0, window_bounds = array<i64: 1, 2, 8, 128>}, {pipeline_mode = #tpu.pipeline_mode<synchronous>, transform_indices = @transform_1, window_bounds = array<i64: 3, 2, 3, 8, 128>}, {pipeline_mode = #tpu.pipeline_mode<synchronous>, transform_indices = @transform_2, window_bounds = array<i64: 8, 128>}, {pipeline_mode = #tpu.pipeline_mode<synchronous>, transform_indices = @transform_3, window_bounds = array<i64: 4, 4, 8, 128>}, {pipeline_mode = #tpu.pipeline_mode<synchronous>, transform_indices = @transform_4, window_bounds = array<i64: 8, 128>}, {transform_indices = @transform_5, window_bounds = array<i64: 1, 4, 8, 128>}, {transform_indices = @transform_6, window_bounds = array<i64: 1, 4, 9, 128>}]} {
    %c0 = arith.constant 0 : index
    %c0_0 = arith.constant 0 : index
    %c0_1 = arith.constant 0 : index
    %c0_2 = arith.constant 0 : index
    %0 = vector.load %arg1[%c0, %c0_0, %c0_1, %c0_2] : memref<1x2x8x128xf32, #tpu.memory_space<vmem>>, vector<1x1x8x128xf32>
    %1 = vector.shape_cast %0 : vector<1x1x8x128xf32> to vector<8x128xf32>
    %c1_i32 = arith.constant 1 : i32
    %2 = tpu.dynamic_rotate %1 by %c1_i32 dim 1 : vector<8x128xf32>, i32 -> vector<8x128xf32>
    %c2_i32 = arith.constant 2 : i32
    %3 = tpu.dynamic_rotate %1 by %c2_i32 dim 1 : vector<8x128xf32>, i32 -> vector<8x128xf32>
    %c0_3 = arith.constant 0 : index
    %c1 = arith.constant 1 : index
    %c0_4 = arith.constant 0 : index
    %c0_5 = arith.constant 0 : index
    %4 = vector.load %arg1[%c0_3, %c1, %c0_4, %c0_5] : memref<1x2x8x128xf32, #tpu.memory_space<vmem>>, vector<1x1x8x128xf32>
    %5 = vector.shape_cast %4 : vector<1x1x8x128xf32> to vector<8x128xf32>
    %c1_i32_6 = arith.constant 1 : i32
    %6 = tpu.dynamic_rotate %5 by %c1_i32_6 dim 1 : vector<8x128xf32>, i32 -> vector<8x128xf32>
    %c2_i32_7 = arith.constant 2 : i32
    %7 = tpu.dynamic_rotate %5 by %c2_i32_7 dim 1 : vector<8x128xf32>, i32 -> vector<8x128xf32>
    %c0_8 = arith.constant 0 : index
    %c0_9 = arith.constant 0 : index
    %c0_10 = arith.constant 0 : index
    %c0_11 = arith.constant 0 : index
    %c0_12 = arith.constant 0 : index
    %8 = vector.load %arg2[%c0_8, %c0_9, %c0_10, %c0_11, %c0_12] : memref<3x2x3x8x128xf32, #tpu.memory_space<vmem>>, vector<1x1x1x8x128xf32>
    %9 = vector.shape_cast %8 : vector<1x1x1x8x128xf32> to vector<8x128xf32>
    %10 = arith.mulf %9, %1 : vector<8x128xf32>
    %c0_13 = arith.constant 0 : index
    %c0_14 = arith.constant 0 : index
    %c1_15 = arith.constant 1 : index
    %c0_16 = arith.constant 0 : index
    %c0_17 = arith.constant 0 : index
    %11 = vector.load %arg2[%c0_13, %c0_14, %c1_15, %c0_16, %c0_17] : memref<3x2x3x8x128xf32, #tpu.memory_space<vmem>>, vector<1x1x1x8x128xf32>
    %12 = vector.shape_cast %11 : vector<1x1x1x8x128xf32> to vector<8x128xf32>
    %13 = arith.mulf %12, %2 : vector<8x128xf32>
    %14 = arith.addf %10, %13 : vector<8x128xf32>
    %c0_18 = arith.constant 0 : index
    %c0_19 = arith.constant 0 : index
    %c2 = arith.constant 2 : index
    %c0_20 = arith.constant 0 : index
    %c0_21 = arith.constant 0 : index
    %15 = vector.load %arg2[%c0_18, %c0_19, %c2, %c0_20, %c0_21] : memref<3x2x3x8x128xf32, #tpu.memory_space<vmem>>, vector<1x1x1x8x128xf32>
    %16 = vector.shape_cast %15 : vector<1x1x1x8x128xf32> to vector<8x128xf32>
    %17 = arith.mulf %16, %3 : vector<8x128xf32>
    %18 = arith.addf %14, %17 : vector<8x128xf32>
    %c0_22 = arith.constant 0 : index
    %c1_23 = arith.constant 1 : index
    %c0_24 = arith.constant 0 : index
    %c0_25 = arith.constant 0 : index
    %c0_26 = arith.constant 0 : index
    %19 = vector.load %arg2[%c0_22, %c1_23, %c0_24, %c0_25, %c0_26] : memref<3x2x3x8x128xf32, #tpu.memory_space<vmem>>, vector<1x1x1x8x128xf32>
    %20 = vector.shape_cast %19 : vector<1x1x1x8x128xf32> to vector<8x128xf32>
    %21 = arith.mulf %20, %5 : vector<8x128xf32>
    %22 = arith.addf %18, %21 : vector<8x128xf32>
    %c0_27 = arith.constant 0 : index
    %c1_28 = arith.constant 1 : index
    %c1_29 = arith.constant 1 : index
    %c0_30 = arith.constant 0 : index
    %c0_31 = arith.constant 0 : index
    %23 = vector.load %arg2[%c0_27, %c1_28, %c1_29, %c0_30, %c0_31] : memref<3x2x3x8x128xf32, #tpu.memory_space<vmem>>, vector<1x1x1x8x128xf32>
    %24 = vector.shape_cast %23 : vector<1x1x1x8x128xf32> to vector<8x128xf32>
    %25 = arith.mulf %24, %6 : vector<8x128xf32>
    %26 = arith.addf %22, %25 : vector<8x128xf32>
    %c0_32 = arith.constant 0 : index
    %c1_33 = arith.constant 1 : index
    %c2_34 = arith.constant 2 : index
    %c0_35 = arith.constant 0 : index
    %c0_36 = arith.constant 0 : index
    %27 = vector.load %arg2[%c0_32, %c1_33, %c2_34, %c0_35, %c0_36] : memref<3x2x3x8x128xf32, #tpu.memory_space<vmem>>, vector<1x1x1x8x128xf32>
    %28 = vector.shape_cast %27 : vector<1x1x1x8x128xf32> to vector<8x128xf32>
    %29 = arith.mulf %28, %7 : vector<8x128xf32>
    %30 = arith.addf %26, %29 : vector<8x128xf32>
    %c1_37 = arith.constant 1 : index
    %c0_38 = arith.constant 0 : index
    %c0_39 = arith.constant 0 : index
    %c0_40 = arith.constant 0 : index
    %c0_41 = arith.constant 0 : index
    %31 = vector.load %arg2[%c1_37, %c0_38, %c0_39, %c0_40, %c0_41] : memref<3x2x3x8x128xf32, #tpu.memory_space<vmem>>, vector<1x1x1x8x128xf32>
    %32 = vector.shape_cast %31 : vector<1x1x1x8x128xf32> to vector<8x128xf32>
    %33 = arith.mulf %32, %1 : vector<8x128xf32>
    %c1_42 = arith.constant 1 : index
    %c0_43 = arith.constant 0 : index
    %c1_44 = arith.constant 1 : index
    %c0_45 = arith.constant 0 : index
    %c0_46 = arith.constant 0 : index
    %34 = vector.load %arg2[%c1_42, %c0_43, %c1_44, %c0_45, %c0_46] : memref<3x2x3x8x128xf32, #tpu.memory_space<vmem>>, vector<1x1x1x8x128xf32>
    %35 = vector.shape_cast %34 : vector<1x1x1x8x128xf32> to vector<8x128xf32>
    %36 = arith.mulf %35, %2 : vector<8x128xf32>
    %37 = arith.addf %33, %36 : vector<8x128xf32>
    %c1_47 = arith.constant 1 : index
    %c0_48 = arith.constant 0 : index
    %c2_49 = arith.constant 2 : index
    %c0_50 = arith.constant 0 : index
    %c0_51 = arith.constant 0 : index
    %38 = vector.load %arg2[%c1_47, %c0_48, %c2_49, %c0_50, %c0_51] : memref<3x2x3x8x128xf32, #tpu.memory_space<vmem>>, vector<1x1x1x8x128xf32>
    %39 = vector.shape_cast %38 : vector<1x1x1x8x128xf32> to vector<8x128xf32>
    %40 = arith.mulf %39, %3 : vector<8x128xf32>
    %41 = arith.addf %37, %40 : vector<8x128xf32>
    %c1_52 = arith.constant 1 : index
    %c1_53 = arith.constant 1 : index
    %c0_54 = arith.constant 0 : index
    %c0_55 = arith.constant 0 : index
    %c0_56 = arith.constant 0 : index
    %42 = vector.load %arg2[%c1_52, %c1_53, %c0_54, %c0_55, %c0_56] : memref<3x2x3x8x128xf32, #tpu.memory_space<vmem>>, vector<1x1x1x8x128xf32>
    %43 = vector.shape_cast %42 : vector<1x1x1x8x128xf32> to vector<8x128xf32>
    %44 = arith.mulf %43, %5 : vector<8x128xf32>
    %45 = arith.addf %41, %44 : vector<8x128xf32>
    %c1_57 = arith.constant 1 : index
    %c1_58 = arith.constant 1 : index
    %c1_59 = arith.constant 1 : index
    %c0_60 = arith.constant 0 : index
    %c0_61 = arith.constant 0 : index
    %46 = vector.load %arg2[%c1_57, %c1_58, %c1_59, %c0_60, %c0_61] : memref<3x2x3x8x128xf32, #tpu.memory_space<vmem>>, vector<1x1x1x8x128xf32>
    %47 = vector.shape_cast %46 : vector<1x1x1x8x128xf32> to vector<8x128xf32>
    %48 = arith.mulf %47, %6 : vector<8x128xf32>
    %49 = arith.addf %45, %48 : vector<8x128xf32>
    %c1_62 = arith.constant 1 : index
    %c1_63 = arith.constant 1 : index
    %c2_64 = arith.constant 2 : index
    %c0_65 = arith.constant 0 : index
    %c0_66 = arith.constant 0 : index
    %50 = vector.load %arg2[%c1_62, %c1_63, %c2_64, %c0_65, %c0_66] : memref<3x2x3x8x128xf32, #tpu.memory_space<vmem>>, vector<1x1x1x8x128xf32>
    %51 = vector.shape_cast %50 : vector<1x1x1x8x128xf32> to vector<8x128xf32>
    %52 = arith.mulf %51, %7 : vector<8x128xf32>
    %53 = arith.addf %49, %52 : vector<8x128xf32>
    %c2_67 = arith.constant 2 : index
    %c0_68 = arith.constant 0 : index
    %c0_69 = arith.constant 0 : index
    %c0_70 = arith.constant 0 : index
    %c0_71 = arith.constant 0 : index
    %54 = vector.load %arg2[%c2_67, %c0_68, %c0_69, %c0_70, %c0_71] : memref<3x2x3x8x128xf32, #tpu.memory_space<vmem>>, vector<1x1x1x8x128xf32>
    %55 = vector.shape_cast %54 : vector<1x1x1x8x128xf32> to vector<8x128xf32>
    %56 = arith.mulf %55, %1 : vector<8x128xf32>
    %c2_72 = arith.constant 2 : index
    %c0_73 = arith.constant 0 : index
    %c1_74 = arith.constant 1 : index
    %c0_75 = arith.constant 0 : index
    %c0_76 = arith.constant 0 : index
    %57 = vector.load %arg2[%c2_72, %c0_73, %c1_74, %c0_75, %c0_76] : memref<3x2x3x8x128xf32, #tpu.memory_space<vmem>>, vector<1x1x1x8x128xf32>
    %58 = vector.shape_cast %57 : vector<1x1x1x8x128xf32> to vector<8x128xf32>
    %59 = arith.mulf %58, %2 : vector<8x128xf32>
    %60 = arith.addf %56, %59 : vector<8x128xf32>
    %c2_77 = arith.constant 2 : index
    %c0_78 = arith.constant 0 : index
    %c2_79 = arith.constant 2 : index
    %c0_80 = arith.constant 0 : index
    %c0_81 = arith.constant 0 : index
    %61 = vector.load %arg2[%c2_77, %c0_78, %c2_79, %c0_80, %c0_81] : memref<3x2x3x8x128xf32, #tpu.memory_space<vmem>>, vector<1x1x1x8x128xf32>
    %62 = vector.shape_cast %61 : vector<1x1x1x8x128xf32> to vector<8x128xf32>
    %63 = arith.mulf %62, %3 : vector<8x128xf32>
    %64 = arith.addf %60, %63 : vector<8x128xf32>
    %c2_82 = arith.constant 2 : index
    %c1_83 = arith.constant 1 : index
    %c0_84 = arith.constant 0 : index
    %c0_85 = arith.constant 0 : index
    %c0_86 = arith.constant 0 : index
    %65 = vector.load %arg2[%c2_82, %c1_83, %c0_84, %c0_85, %c0_86] : memref<3x2x3x8x128xf32, #tpu.memory_space<vmem>>, vector<1x1x1x8x128xf32>
    %66 = vector.shape_cast %65 : vector<1x1x1x8x128xf32> to vector<8x128xf32>
    %67 = arith.mulf %66, %5 : vector<8x128xf32>
    %68 = arith.addf %64, %67 : vector<8x128xf32>
    %c2_87 = arith.constant 2 : index
    %c1_88 = arith.constant 1 : index
    %c1_89 = arith.constant 1 : index
    %c0_90 = arith.constant 0 : index
    %c0_91 = arith.constant 0 : index
    %69 = vector.load %arg2[%c2_87, %c1_88, %c1_89, %c0_90, %c0_91] : memref<3x2x3x8x128xf32, #tpu.memory_space<vmem>>, vector<1x1x1x8x128xf32>
    %70 = vector.shape_cast %69 : vector<1x1x1x8x128xf32> to vector<8x128xf32>
    %71 = arith.mulf %70, %6 : vector<8x128xf32>
    %72 = arith.addf %68, %71 : vector<8x128xf32>
    %c2_92 = arith.constant 2 : index
    %c1_93 = arith.constant 1 : index
    %c2_94 = arith.constant 2 : index
    %c0_95 = arith.constant 0 : index
    %c0_96 = arith.constant 0 : index
    %73 = vector.load %arg2[%c2_92, %c1_93, %c2_94, %c0_95, %c0_96] : memref<3x2x3x8x128xf32, #tpu.memory_space<vmem>>, vector<1x1x1x8x128xf32>
    %74 = vector.shape_cast %73 : vector<1x1x1x8x128xf32> to vector<8x128xf32>
    %75 = arith.mulf %74, %7 : vector<8x128xf32>
    %76 = arith.addf %72, %75 : vector<8x128xf32>
    %c0_97 = arith.constant 0 : index
    %c0_98 = arith.constant 0 : index
    %77 = vector.load %arg3[%c0_97, %c0_98] : memref<8x128xf32, #tpu.memory_space<vmem>>, vector<8x128xf32>
    %cst = arith.constant 0.000000e+00 : f32
    %78 = vector.broadcast %cst : f32 to vector<1x128xf32>
    %79 = vector.extract_strided_slice %76 {offsets = [0, 0], sizes = [7, 128], strides = [1, 1]} : vector<8x128xf32> to vector<7x128xf32>
    %80 = tpu.concatenate %78, %79 in 0 : vector<1x128xf32>, vector<7x128xf32> -> vector<8x128xf32>
    %81 = arith.addf %30, %80 : vector<8x128xf32>
    %82 = arith.addf %81, %77 : vector<8x128xf32>
    %83 = vector.extract_strided_slice %76 {offsets = [7, 0], sizes = [1, 128], strides = [1, 1]} : vector<8x128xf32> to vector<1x128xf32>
    %84 = vector.extract_strided_slice %77 {offsets = [0, 0], sizes = [1, 128], strides = [1, 1]} : vector<8x128xf32> to vector<1x128xf32>
    %85 = arith.addf %83, %84 : vector<1x128xf32>
    %86 = arith.addf %53, %77 : vector<8x128xf32>
    %cst_99 = arith.constant 5.000000e-01 : f32
    %87 = vector.broadcast %cst_99 : f32 to vector<8x128xf32>
    %88 = arith.mulf %82, %87 : vector<8x128xf32>
    %cst_100 = arith.constant 1.000000e+00 : f32
    %89 = vector.broadcast %cst_100 : f32 to vector<8x128xf32>
    %90 = arith.addf %88, %89 : vector<8x128xf32>
    %c0_101 = arith.constant 0 : index
    %c0_102 = arith.constant 0 : index
    %c0_103 = arith.constant 0 : index
    %c0_104 = arith.constant 0 : index
    %91 = vector.load %arg7[%c0_101, %c0_102, %c0_103, %c0_104] : memref<1x4x9x128xf32, #tpu.memory_space<vmem>>, vector<1x1x8x128xf32>
    %92 = vector.shape_cast %91 : vector<1x1x8x128xf32> to vector<8x128xf32>
    %93 = vector.shape_cast %90 : vector<8x128xf32> to vector<1x1x8x128xf32>
    tpu.vector_store %arg7[%c0_101, %c0_102, %c0_103, %c0_104], %93 {strides = array<i32>} : memref<1x4x9x128xf32, #tpu.memory_space<vmem>>, vector<1x1x8x128xf32>,
    %cst_105 = arith.constant 5.000000e-01 : f32
    %94 = vector.broadcast %cst_105 : f32 to vector<1x128xf32>
    %95 = arith.mulf %85, %94 : vector<1x128xf32>
    %cst_106 = arith.constant 1.000000e+00 : f32
    %96 = vector.broadcast %cst_106 : f32 to vector<1x128xf32>
    %97 = arith.addf %95, %96 : vector<1x128xf32>
    %c0_107 = arith.constant 0 : index
    %c0_108 = arith.constant 0 : index
    %c8 = arith.constant 8 : index
    %c0_109 = arith.constant 0 : index
    %98 = vector.load %arg7[%c0_107, %c0_108, %c8, %c0_109] : memref<1x4x9x128xf32, #tpu.memory_space<vmem>>, vector<1x1x1x128xf32>
    %99 = vector.shape_cast %98 : vector<1x1x1x128xf32> to vector<1x128xf32>
    %100 = vector.shape_cast %97 : vector<1x128xf32> to vector<1x1x1x128xf32>
    tpu.vector_store %arg7[%c0_107, %c0_108, %c8, %c0_109], %100 {strides = array<i32>} : memref<1x4x9x128xf32, #tpu.memory_space<vmem>>, vector<1x1x1x128xf32>,
    %cst_110 = arith.constant 5.000000e-01 : f32
    %101 = vector.broadcast %cst_110 : f32 to vector<8x128xf32>
    %102 = arith.mulf %86, %101 : vector<8x128xf32>
    %cst_111 = arith.constant 1.000000e+00 : f32
    %103 = vector.broadcast %cst_111 : f32 to vector<8x128xf32>
    %104 = arith.addf %102, %103 : vector<8x128xf32>
    %c0_112 = arith.constant 0 : index
    %c1_113 = arith.constant 1 : index
    %c0_114 = arith.constant 0 : index
    %c0_115 = arith.constant 0 : index
    %105 = vector.load %arg7[%c0_112, %c1_113, %c0_114, %c0_115] : memref<1x4x9x128xf32, #tpu.memory_space<vmem>>, vector<1x1x8x128xf32>
    %106 = vector.shape_cast %105 : vector<1x1x8x128xf32> to vector<8x128xf32>
    %107 = vector.shape_cast %104 : vector<8x128xf32> to vector<1x1x8x128xf32>
    tpu.vector_store %arg7[%c0_112, %c1_113, %c0_114, %c0_115], %107 {strides = array<i32>} : memref<1x4x9x128xf32, #tpu.memory_space<vmem>>, vector<1x1x8x128xf32>,
    %c0_116 = arith.constant 0 : index
    %c1_117 = arith.constant 1 : index
    %c8_118 = arith.constant 8 : index
    %c0_119 = arith.constant 0 : index
    %108 = vector.load %arg7[%c0_116, %c1_117, %c8_118, %c0_119] : memref<1x4x9x128xf32, #tpu.memory_space<vmem>>, vector<1x1x1x128xf32>
    %109 = vector.shape_cast %108 : vector<1x1x1x128xf32> to vector<1x128xf32>
    %110 = vector.shape_cast %78 : vector<1x128xf32> to vector<1x1x1x128xf32>
    tpu.vector_store %arg7[%c0_116, %c1_117, %c8_118, %c0_119], %110 {strides = array<i32>} : memref<1x4x9x128xf32, #tpu.memory_space<vmem>>, vector<1x1x1x128xf32>,
    %cst_120 = arith.constant 0.707106769 : f32
    %111 = vector.broadcast %cst_120 : f32 to vector<8x128xf32>
    %112 = arith.mulf %82, %111 : vector<8x128xf32>
    %113 = math.absf %112 : vector<8x128xf32>
    %cst_121 = arith.constant 0.327591091 : f32
    %114 = vector.broadcast %cst_121 : f32 to vector<8x128xf32>
    %115 = arith.mulf %114, %113 : vector<8x128xf32>
    %cst_122 = arith.constant 1.000000e+00 : f32
    %116 = vector.broadcast %cst_122 : f32 to vector<8x128xf32>
    %117 = arith.addf %116, %115 : vector<8x128xf32>
    %118 = tpu.reciprocal %117 {approx = true} : vector<8x128xf32> -> vector<8x128xf32>
    %119 = arith.mulf %117, %118 : vector<8x128xf32>
    %cst_123 = arith.constant 2.000000e+00 : f32
    %120 = vector.broadcast %cst_123 : f32 to vector<8x128xf32>
    %121 = arith.subf %120, %119 : vector<8x128xf32>
    %122 = arith.mulf %118, %121 : vector<8x128xf32>
    %cst_124 = arith.constant 1.06140542 : f32
    %123 = vector.broadcast %cst_124 : f32 to vector<8x128xf32>
    %124 = arith.mulf %123, %122 : vector<8x128xf32>
    %cst_125 = arith.constant -1.45315206 : f32
    %125 = vector.broadcast %cst_125 : f32 to vector<8x128xf32>
    %126 = arith.addf %124, %125 : vector<8x128xf32>
    %127 = arith.mulf %126, %122 : vector<8x128xf32>
    %cst_126 = arith.constant 1.42141378 : f32
    %128 = vector.broadcast %cst_126 : f32 to vector<8x128xf32>
    %129 = arith.addf %127, %128 : vector<8x128xf32>
    %130 = arith.mulf %129, %122 : vector<8x128xf32>
    %cst_127 = arith.constant -0.284496725 : f32
    %131 = vector.broadcast %cst_127 : f32 to vector<8x128xf32>
    %132 = arith.addf %130, %131 : vector<8x128xf32>
    %133 = arith.mulf %132, %122 : vector<8x128xf32>
    %cst_128 = arith.constant 0.254829586 : f32
    %134 = vector.broadcast %cst_128 : f32 to vector<8x128xf32>
    %135 = arith.addf %133, %134 : vector<8x128xf32>
    %136 = arith.mulf %135, %122 : vector<8x128xf32>
    %cst_129 = arith.constant 0.000000e+00 : f32
    %137 = vector.broadcast %cst_129 : f32 to vector<8x128xf32>
    %138 = arith.cmpf oge, %112, %137 : vector<8x128xf32>
    %cst_130 = arith.constant 1.000000e+00 : f32
    %cst_131 = arith.constant -1.000000e+00 : f32
    %139 = vector.broadcast %cst_130 : f32 to vector<8x128xf32>
    %140 = vector.broadcast %cst_131 : f32 to vector<8x128xf32>
    %141 = arith.select %138, %139, %140 : vector<8x128xi1>, vector<8x128xf32>
    %cst_132 = arith.constant 0.000000e+00 : f32
    %142 = vector.broadcast %cst_132 : f32 to vector<8x128xf32>
    %143 = arith.subf %142, %113 : vector<8x128xf32>
    %144 = arith.mulf %143, %113 : vector<8x128xf32>
    %145 = math.exp %144 : vector<8x128xf32>
    %146 = arith.mulf %136, %145 : vector<8x128xf32>
    %cst_133 = arith.constant 1.000000e+00 : f32
    %147 = vector.broadcast %cst_133 : f32 to vector<8x128xf32>
    %148 = arith.subf %147, %146 : vector<8x128xf32>
    %149 = arith.mulf %141, %148 : vector<8x128xf32>
    %c0_134 = arith.constant 0 : index
    %c2_135 = arith.constant 2 : index
    %c0_136 = arith.constant 0 : index
    %c0_137 = arith.constant 0 : index
    %150 = vector.load %arg7[%c0_134, %c2_135, %c0_136, %c0_137] : memref<1x4x9x128xf32, #tpu.memory_space<vmem>>, vector<1x1x8x128xf32>
    %151 = vector.shape_cast %150 : vector<1x1x8x128xf32> to vector<8x128xf32>
    %152 = vector.shape_cast %149 : vector<8x128xf32> to vector<1x1x8x128xf32>
    tpu.vector_store %arg7[%c0_134, %c2_135, %c0_136, %c0_137], %152 {strides = array<i32>} : memref<1x4x9x128xf32, #tpu.memory_space<vmem>>, vector<1x1x8x128xf32>,
    %cst_138 = arith.constant 0.707106769 : f32
    %153 = vector.broadcast %cst_138 : f32 to vector<1x128xf32>
    %154 = arith.mulf %85, %153 : vector<1x128xf32>
    %155 = math.absf %154 : vector<1x128xf32>
    %cst_139 = arith.constant 0.327591091 : f32
    %156 = vector.broadcast %cst_139 : f32 to vector<1x128xf32>
    %157 = arith.mulf %156, %155 : vector<1x128xf32>
    %cst_140 = arith.constant 1.000000e+00 : f32
    %158 = vector.broadcast %cst_140 : f32 to vector<1x128xf32>
    %159 = arith.addf %158, %157 : vector<1x128xf32>
    %160 = tpu.reciprocal %159 {approx = true} : vector<1x128xf32> -> vector<1x128xf32>
    %161 = arith.mulf %159, %160 : vector<1x128xf32>
    %cst_141 = arith.constant 2.000000e+00 : f32
    %162 = vector.broadcast %cst_141 : f32 to vector<1x128xf32>
    %163 = arith.subf %162, %161 : vector<1x128xf32>
    %164 = arith.mulf %160, %163 : vector<1x128xf32>
    %cst_142 = arith.constant 1.06140542 : f32
    %165 = vector.broadcast %cst_142 : f32 to vector<1x128xf32>
    %166 = arith.mulf %165, %164 : vector<1x128xf32>
    %cst_143 = arith.constant -1.45315206 : f32
    %167 = vector.broadcast %cst_143 : f32 to vector<1x128xf32>
    %168 = arith.addf %166, %167 : vector<1x128xf32>
    %169 = arith.mulf %168, %164 : vector<1x128xf32>
    %cst_144 = arith.constant 1.42141378 : f32
    %170 = vector.broadcast %cst_144 : f32 to vector<1x128xf32>
    %171 = arith.addf %169, %170 : vector<1x128xf32>
    %172 = arith.mulf %171, %164 : vector<1x128xf32>
    %cst_145 = arith.constant -0.284496725 : f32
    %173 = vector.broadcast %cst_145 : f32 to vector<1x128xf32>
    %174 = arith.addf %172, %173 : vector<1x128xf32>
    %175 = arith.mulf %174, %164 : vector<1x128xf32>
    %cst_146 = arith.constant 0.254829586 : f32
    %176 = vector.broadcast %cst_146 : f32 to vector<1x128xf32>
    %177 = arith.addf %175, %176 : vector<1x128xf32>
    %178 = arith.mulf %177, %164 : vector<1x128xf32>
    %cst_147 = arith.constant 0.000000e+00 : f32
    %179 = vector.broadcast %cst_147 : f32 to vector<1x128xf32>
    %180 = arith.cmpf oge, %154, %179 : vector<1x128xf32>
    %cst_148 = arith.constant 1.000000e+00 : f32
    %cst_149 = arith.constant -1.000000e+00 : f32
    %181 = vector.broadcast %cst_148 : f32 to vector<1x128xf32>
    %182 = vector.broadcast %cst_149 : f32 to vector<1x128xf32>
    %183 = arith.select %180, %181, %182 : vector<1x128xi1>, vector<1x128xf32>
    %cst_150 = arith.constant 0.000000e+00 : f32
    %184 = vector.broadcast %cst_150 : f32 to vector<1x128xf32>
    %185 = arith.subf %184, %155 : vector<1x128xf32>
    %186 = arith.mulf %185, %155 : vector<1x128xf32>
    %187 = math.exp %186 : vector<1x128xf32>
    %188 = arith.mulf %178, %187 : vector<1x128xf32>
    %cst_151 = arith.constant 1.000000e+00 : f32
    %189 = vector.broadcast %cst_151 : f32 to vector<1x128xf32>
    %190 = arith.subf %189, %188 : vector<1x128xf32>
    %191 = arith.mulf %183, %190 : vector<1x128xf32>
    %c0_152 = arith.constant 0 : index
    %c2_153 = arith.constant 2 : index
    %c8_154 = arith.constant 8 : index
    %c0_155 = arith.constant 0 : index
    %192 = vector.load %arg7[%c0_152, %c2_153, %c8_154, %c0_155] : memref<1x4x9x128xf32, #tpu.memory_space<vmem>>, vector<1x1x1x128xf32>
    %193 = vector.shape_cast %192 : vector<1x1x1x128xf32> to vector<1x128xf32>
    %194 = vector.shape_cast %191 : vector<1x128xf32> to vector<1x1x1x128xf32>
    tpu.vector_store %arg7[%c0_152, %c2_153, %c8_154, %c0_155], %194 {strides = array<i32>} : memref<1x4x9x128xf32, #tpu.memory_space<vmem>>, vector<1x1x1x128xf32>,
    %cst_156 = arith.constant 0.707106769 : f32
    %195 = vector.broadcast %cst_156 : f32 to vector<8x128xf32>
    %196 = arith.mulf %86, %195 : vector<8x128xf32>
    %197 = math.absf %196 : vector<8x128xf32>
    %cst_157 = arith.constant 0.327591091 : f32
    %198 = vector.broadcast %cst_157 : f32 to vector<8x128xf32>
    %199 = arith.mulf %198, %197 : vector<8x128xf32>
    %cst_158 = arith.constant 1.000000e+00 : f32
    %200 = vector.broadcast %cst_158 : f32 to vector<8x128xf32>
    %201 = arith.addf %200, %199 : vector<8x128xf32>
    %202 = tpu.reciprocal %201 {approx = true} : vector<8x128xf32> -> vector<8x128xf32>
    %203 = arith.mulf %201, %202 : vector<8x128xf32>
    %cst_159 = arith.constant 2.000000e+00 : f32
    %204 = vector.broadcast %cst_159 : f32 to vector<8x128xf32>
    %205 = arith.subf %204, %203 : vector<8x128xf32>
    %206 = arith.mulf %202, %205 : vector<8x128xf32>
    %cst_160 = arith.constant 1.06140542 : f32
    %207 = vector.broadcast %cst_160 : f32 to vector<8x128xf32>
    %208 = arith.mulf %207, %206 : vector<8x128xf32>
    %cst_161 = arith.constant -1.45315206 : f32
    %209 = vector.broadcast %cst_161 : f32 to vector<8x128xf32>
    %210 = arith.addf %208, %209 : vector<8x128xf32>
    %211 = arith.mulf %210, %206 : vector<8x128xf32>
    %cst_162 = arith.constant 1.42141378 : f32
    %212 = vector.broadcast %cst_162 : f32 to vector<8x128xf32>
    %213 = arith.addf %211, %212 : vector<8x128xf32>
    %214 = arith.mulf %213, %206 : vector<8x128xf32>
    %cst_163 = arith.constant -0.284496725 : f32
    %215 = vector.broadcast %cst_163 : f32 to vector<8x128xf32>
    %216 = arith.addf %214, %215 : vector<8x128xf32>
    %217 = arith.mulf %216, %206 : vector<8x128xf32>
    %cst_164 = arith.constant 0.254829586 : f32
    %218 = vector.broadcast %cst_164 : f32 to vector<8x128xf32>
    %219 = arith.addf %217, %218 : vector<8x128xf32>
    %220 = arith.mulf %219, %206 : vector<8x128xf32>
    %cst_165 = arith.constant 0.000000e+00 : f32
    %221 = vector.broadcast %cst_165 : f32 to vector<8x128xf32>
    %222 = arith.cmpf oge, %196, %221 : vector<8x128xf32>
    %cst_166 = arith.constant 1.000000e+00 : f32
    %cst_167 = arith.constant -1.000000e+00 : f32
    %223 = vector.broadcast %cst_166 : f32 to vector<8x128xf32>
    %224 = vector.broadcast %cst_167 : f32 to vector<8x128xf32>
    %225 = arith.select %222, %223, %224 : vector<8x128xi1>, vector<8x128xf32>
    %cst_168 = arith.constant 0.000000e+00 : f32
    %226 = vector.broadcast %cst_168 : f32 to vector<8x128xf32>
    %227 = arith.subf %226, %197 : vector<8x128xf32>
    %228 = arith.mulf %227, %197 : vector<8x128xf32>
    %229 = math.exp %228 : vector<8x128xf32>
    %230 = arith.mulf %220, %229 : vector<8x128xf32>
    %cst_169 = arith.constant 1.000000e+00 : f32
    %231 = vector.broadcast %cst_169 : f32 to vector<8x128xf32>
    %232 = arith.subf %231, %230 : vector<8x128xf32>
    %233 = arith.mulf %225, %232 : vector<8x128xf32>
    %c0_170 = arith.constant 0 : index
    %c3 = arith.constant 3 : index
    %c0_171 = arith.constant 0 : index
    %c0_172 = arith.constant 0 : index
    %234 = vector.load %arg7[%c0_170, %c3, %c0_171, %c0_172] : memref<1x4x9x128xf32, #tpu.memory_space<vmem>>, vector<1x1x8x128xf32>
    %235 = vector.shape_cast %234 : vector<1x1x8x128xf32> to vector<8x128xf32>
    %236 = vector.shape_cast %233 : vector<8x128xf32> to vector<1x1x8x128xf32>
    tpu.vector_store %arg7[%c0_170, %c3, %c0_171, %c0_172], %236 {strides = array<i32>} : memref<1x4x9x128xf32, #tpu.memory_space<vmem>>, vector<1x1x8x128xf32>,
    %c0_173 = arith.constant 0 : index
    %c3_174 = arith.constant 3 : index
    %c8_175 = arith.constant 8 : index
    %c0_176 = arith.constant 0 : index
    %237 = vector.load %arg7[%c0_173, %c3_174, %c8_175, %c0_176] : memref<1x4x9x128xf32, #tpu.memory_space<vmem>>, vector<1x1x1x128xf32>
    %238 = vector.shape_cast %237 : vector<1x1x1x128xf32> to vector<1x128xf32>
    %239 = vector.shape_cast %78 : vector<1x128xf32> to vector<1x1x1x128xf32>
    tpu.vector_store %arg7[%c0_173, %c3_174, %c8_175, %c0_176], %239 {strides = array<i32>} : memref<1x4x9x128xf32, #tpu.memory_space<vmem>>, vector<1x1x1x128xf32>,
    %240 = tpu.iota {dimensions = array<i32: 1>} : vector<8x128xi32>
    %c32_i32 = arith.constant 32 : i32
    %c0_i32 = arith.constant 0 : i32
    %241 = arith.cmpi eq, %c32_i32, %c0_i32 : i32
    %c1_i32_177 = arith.constant 1 : i32
    %242 = arith.select %241, %c1_i32_177, %c32_i32 : i32
    %243 = vector.broadcast %242 : i32 to vector<8x128xi32>
    %244 = arith.remsi %240, %243 : vector<8x128xi32>
    %c0_i32_178 = arith.constant 0 : i32
    %245 = vector.broadcast %c0_i32_178 : i32 to vector<8x128xi32>
    %246 = arith.cmpi ne, %244, %245 : vector<8x128xi32>
    %c0_i32_179 = arith.constant 0 : i32
    %247 = vector.broadcast %c0_i32_179 : i32 to vector<8x128xi32>
    %248 = arith.cmpi slt, %244, %247 : vector<8x128xi32>
    %c0_i32_180 = arith.constant 0 : i32
    %249 = arith.cmpi slt, %242, %c0_i32_180 : i32
    %250 = vector.broadcast %249 : i1 to vector<8x128xi1>
    %251 = vector.broadcast %250 : vector<8x128xi1> to vector<8x128xi1>
    %252 = arith.xori %248, %251 : vector<8x128xi1>
    %253 = arith.andi %252, %246 : vector<8x128xi1>
    %254 = vector.broadcast %242 : i32 to vector<8x128xi32>
    %255 = arith.addi %244, %254 : vector<8x128xi32>
    %256 = arith.select %253, %255, %244 : vector<8x128xi1>, vector<8x128xi32>
    %c16_i32 = arith.constant 16 : i32
    %257 = vector.broadcast %c16_i32 : i32 to vector<8x128xi32>
    %258 = arith.cmpi slt, %256, %257 : vector<8x128xi32>
    %c15_i32 = arith.constant 15 : i32
    %259 = tpu.dynamic_rotate %82 by %c15_i32 dim 1 : vector<8x128xf32>, i32 -> vector<8x128xf32>
    %260 = arith.select %258, %82, %259 : vector<8x128xi1>, vector<8x128xf32>
    %c15_i32_181 = arith.constant 15 : i32
    %261 = tpu.dynamic_rotate %86 by %c15_i32_181 dim 1 : vector<8x128xf32>, i32 -> vector<8x128xf32>
    %262 = arith.select %258, %86, %261 : vector<8x128xi1>, vector<8x128xf32>
    %263 = vector.extract_strided_slice %82 {offsets = [1, 0], sizes = [7, 128], strides = [1, 1]} : vector<8x128xf32> to vector<7x128xf32>
    %264 = tpu.concatenate %263, %85 in 0 : vector<7x128xf32>, vector<1x128xf32> -> vector<8x128xf32>
    %c15_i32_182 = arith.constant 15 : i32
    %265 = tpu.dynamic_rotate %264 by %c15_i32_182 dim 1 : vector<8x128xf32>, i32 -> vector<8x128xf32>
    %266 = arith.select %258, %264, %265 : vector<8x128xi1>, vector<8x128xf32>
    %c0_183 = arith.constant 0 : index
    %c0_184 = arith.constant 0 : index
    %267 = vector.load %arg5[%c0_183, %c0_184] : memref<8x128xf32, #tpu.memory_space<vmem>>, vector<8x128xf32>
    %c0_185 = arith.constant 0 : index
    %c0_186 = arith.constant 0 : index
    %c0_187 = arith.constant 0 : index
    %c0_188 = arith.constant 0 : index
    %268 = vector.load %arg4[%c0_185, %c0_186, %c0_187, %c0_188] : memref<4x4x8x128xf32, #tpu.memory_space<vmem>>, vector<1x1x8x128xf32>
    %269 = vector.shape_cast %268 : vector<1x1x8x128xf32> to vector<8x128xf32>
    %270 = arith.mulf %269, %260 : vector<8x128xf32>
    %271 = arith.addf %267, %270 : vector<8x128xf32>
    %c32_i32_189 = arith.constant 32 : i32
    %272 = tpu.dynamic_rotate %260 by %c32_i32_189 dim 1 : vector<8x128xf32>, i32 -> vector<8x128xf32>
    %c0_190 = arith.constant 0 : index
    %c1_191 = arith.constant 1 : index
    %c0_192 = arith.constant 0 : index
    %c0_193 = arith.constant 0 : index
    %273 = vector.load %arg4[%c0_190, %c1_191, %c0_192, %c0_193] : memref<4x4x8x128xf32, #tpu.memory_space<vmem>>, vector<1x1x8x128xf32>
    %274 = vector.shape_cast %273 : vector<1x1x8x128xf32> to vector<8x128xf32>
    %275 = arith.mulf %274, %272 : vector<8x128xf32>
    %276 = arith.addf %271, %275 : vector<8x128xf32>
    %c64_i32 = arith.constant 64 : i32
    %277 = tpu.dynamic_rotate %260 by %c64_i32 dim 1 : vector<8x128xf32>, i32 -> vector<8x128xf32>
    %c0_194 = arith.constant 0 : index
    %c2_195 = arith.constant 2 : index
    %c0_196 = arith.constant 0 : index
    %c0_197 = arith.constant 0 : index
    %278 = vector.load %arg4[%c0_194, %c2_195, %c0_196, %c0_197] : memref<4x4x8x128xf32, #tpu.memory_space<vmem>>, vector<1x1x8x128xf32>
    %279 = vector.shape_cast %278 : vector<1x1x8x128xf32> to vector<8x128xf32>
    %280 = arith.mulf %279, %277 : vector<8x128xf32>
    %281 = arith.addf %276, %280 : vector<8x128xf32>
    %c96_i32 = arith.constant 96 : i32
    %282 = tpu.dynamic_rotate %260 by %c96_i32 dim 1 : vector<8x128xf32>, i32 -> vector<8x128xf32>
    %c0_198 = arith.constant 0 : index
    %c3_199 = arith.constant 3 : index
    %c0_200 = arith.constant 0 : index
    %c0_201 = arith.constant 0 : index
    %283 = vector.load %arg4[%c0_198, %c3_199, %c0_200, %c0_201] : memref<4x4x8x128xf32, #tpu.memory_space<vmem>>, vector<1x1x8x128xf32>
    %284 = vector.shape_cast %283 : vector<1x1x8x128xf32> to vector<8x128xf32>
    %285 = arith.mulf %284, %282 : vector<8x128xf32>
    %286 = arith.addf %281, %285 : vector<8x128xf32>
    %c0_202 = arith.constant 0 : index
    %c0_203 = arith.constant 0 : index
    %c0_204 = arith.constant 0 : index
    %c0_205 = arith.constant 0 : index
    %287 = vector.load %arg6[%c0_202, %c0_203, %c0_204, %c0_205] : memref<1x4x8x128xf32, #tpu.memory_space<vmem>>, vector<1x1x8x128xf32>
    %288 = vector.shape_cast %287 : vector<1x1x8x128xf32> to vector<8x128xf32>
    %289 = vector.shape_cast %286 : vector<8x128xf32> to vector<1x1x8x128xf32>
    tpu.vector_store %arg6[%c0_202, %c0_203, %c0_204, %c0_205], %289 {strides = array<i32>} : memref<1x4x8x128xf32, #tpu.memory_space<vmem>>, vector<1x1x8x128xf32>,
    %c1_206 = arith.constant 1 : index
    %c0_207 = arith.constant 0 : index
    %c0_208 = arith.constant 0 : index
    %c0_209 = arith.constant 0 : index
    %290 = vector.load %arg4[%c1_206, %c0_207, %c0_208, %c0_209] : memref<4x4x8x128xf32, #tpu.memory_space<vmem>>, vector<1x1x8x128xf32>
    %291 = vector.shape_cast %290 : vector<1x1x8x128xf32> to vector<8x128xf32>
    %292 = arith.mulf %291, %262 : vector<8x128xf32>
    %293 = arith.addf %267, %292 : vector<8x128xf32>
    %c2_210 = arith.constant 2 : index
    %c0_211 = arith.constant 0 : index
    %c0_212 = arith.constant 0 : index
    %c0_213 = arith.constant 0 : index
    %294 = vector.load %arg4[%c2_210, %c0_211, %c0_212, %c0_213] : memref<4x4x8x128xf32, #tpu.memory_space<vmem>>, vector<1x1x8x128xf32>
    %295 = vector.shape_cast %294 : vector<1x1x8x128xf32> to vector<8x128xf32>
    %296 = arith.mulf %295, %262 : vector<8x128xf32>
    %297 = arith.addf %267, %296 : vector<8x128xf32>
    %c32_i32_214 = arith.constant 32 : i32
    %298 = tpu.dynamic_rotate %262 by %c32_i32_214 dim 1 : vector<8x128xf32>, i32 -> vector<8x128xf32>
    %c1_215 = arith.constant 1 : index
    %c1_216 = arith.constant 1 : index
    %c0_217 = arith.constant 0 : index
    %c0_218 = arith.constant 0 : index
    %299 = vector.load %arg4[%c1_215, %c1_216, %c0_217, %c0_218] : memref<4x4x8x128xf32, #tpu.memory_space<vmem>>, vector<1x1x8x128xf32>
    %300 = vector.shape_cast %299 : vector<1x1x8x128xf32> to vector<8x128xf32>
    %301 = arith.mulf %300, %298 : vector<8x128xf32>
    %302 = arith.addf %293, %301 : vector<8x128xf32>
    %c2_219 = arith.constant 2 : index
    %c1_220 = arith.constant 1 : index
    %c0_221 = arith.constant 0 : index
    %c0_222 = arith.constant 0 : index
    %303 = vector.load %arg4[%c2_219, %c1_220, %c0_221, %c0_222] : memref<4x4x8x128xf32, #tpu.memory_space<vmem>>, vector<1x1x8x128xf32>
    %304 = vector.shape_cast %303 : vector<1x1x8x128xf32> to vector<8x128xf32>
    %305 = arith.mulf %304, %298 : vector<8x128xf32>
    %306 = arith.addf %297, %305 : vector<8x128xf32>
    %c64_i32_223 = arith.constant 64 : i32
    %307 = tpu.dynamic_rotate %262 by %c64_i32_223 dim 1 : vector<8x128xf32>, i32 -> vector<8x128xf32>
    %c1_224 = arith.constant 1 : index
    %c2_225 = arith.constant 2 : index
    %c0_226 = arith.constant 0 : index
    %c0_227 = arith.constant 0 : index
    %308 = vector.load %arg4[%c1_224, %c2_225, %c0_226, %c0_227] : memref<4x4x8x128xf32, #tpu.memory_space<vmem>>, vector<1x1x8x128xf32>
    %309 = vector.shape_cast %308 : vector<1x1x8x128xf32> to vector<8x128xf32>
    %310 = arith.mulf %309, %307 : vector<8x128xf32>
    %311 = arith.addf %302, %310 : vector<8x128xf32>
    %c2_228 = arith.constant 2 : index
    %c2_229 = arith.constant 2 : index
    %c0_230 = arith.constant 0 : index
    %c0_231 = arith.constant 0 : index
    %312 = vector.load %arg4[%c2_228, %c2_229, %c0_230, %c0_231] : memref<4x4x8x128xf32, #tpu.memory_space<vmem>>, vector<1x1x8x128xf32>
    %313 = vector.shape_cast %312 : vector<1x1x8x128xf32> to vector<8x128xf32>
    %314 = arith.mulf %313, %307 : vector<8x128xf32>
    %315 = arith.addf %306, %314 : vector<8x128xf32>
    %c96_i32_232 = arith.constant 96 : i32
    %316 = tpu.dynamic_rotate %262 by %c96_i32_232 dim 1 : vector<8x128xf32>, i32 -> vector<8x128xf32>
    %c1_233 = arith.constant 1 : index
    %c3_234 = arith.constant 3 : index
    %c0_235 = arith.constant 0 : index
    %c0_236 = arith.constant 0 : index
    %317 = vector.load %arg4[%c1_233, %c3_234, %c0_235, %c0_236] : memref<4x4x8x128xf32, #tpu.memory_space<vmem>>, vector<1x1x8x128xf32>
    %318 = vector.shape_cast %317 : vector<1x1x8x128xf32> to vector<8x128xf32>
    %319 = arith.mulf %318, %316 : vector<8x128xf32>
    %320 = arith.addf %311, %319 : vector<8x128xf32>
    %c2_237 = arith.constant 2 : index
    %c3_238 = arith.constant 3 : index
    %c0_239 = arith.constant 0 : index
    %c0_240 = arith.constant 0 : index
    %321 = vector.load %arg4[%c2_237, %c3_238, %c0_239, %c0_240] : memref<4x4x8x128xf32, #tpu.memory_space<vmem>>, vector<1x1x8x128xf32>
    %322 = vector.shape_cast %321 : vector<1x1x8x128xf32> to vector<8x128xf32>
    %323 = arith.mulf %322, %316 : vector<8x128xf32>
    %324 = arith.addf %315, %323 : vector<8x128xf32>
    %c0_241 = arith.constant 0 : index
    %c1_242 = arith.constant 1 : index
    %c0_243 = arith.constant 0 : index
    %c0_244 = arith.constant 0 : index
    %325 = vector.load %arg6[%c0_241, %c1_242, %c0_243, %c0_244] : memref<1x4x8x128xf32, #tpu.memory_space<vmem>>, vector<1x1x8x128xf32>
    %326 = vector.shape_cast %325 : vector<1x1x8x128xf32> to vector<8x128xf32>
    %327 = vector.shape_cast %320 : vector<8x128xf32> to vector<1x1x8x128xf32>
    tpu.vector_store %arg6[%c0_241, %c1_242, %c0_243, %c0_244], %327 {strides = array<i32>} : memref<1x4x8x128xf32, #tpu.memory_space<vmem>>, vector<1x1x8x128xf32>,
    %c0_245 = arith.constant 0 : index
    %c2_246 = arith.constant 2 : index
    %c0_247 = arith.constant 0 : index
    %c0_248 = arith.constant 0 : index
    %328 = vector.load %arg6[%c0_245, %c2_246, %c0_247, %c0_248] : memref<1x4x8x128xf32, #tpu.memory_space<vmem>>, vector<1x1x8x128xf32>
    %329 = vector.shape_cast %328 : vector<1x1x8x128xf32> to vector<8x128xf32>
    %330 = vector.shape_cast %324 : vector<8x128xf32> to vector<1x1x8x128xf32>
    tpu.vector_store %arg6[%c0_245, %c2_246, %c0_247, %c0_248], %330 {strides = array<i32>} : memref<1x4x8x128xf32, #tpu.memory_space<vmem>>, vector<1x1x8x128xf32>,
    %c3_249 = arith.constant 3 : index
    %c0_250 = arith.constant 0 : index
    %c0_251 = arith.constant 0 : index
    %c0_252 = arith.constant 0 : index
    %331 = vector.load %arg4[%c3_249, %c0_250, %c0_251, %c0_252] : memref<4x4x8x128xf32, #tpu.memory_space<vmem>>, vector<1x1x8x128xf32>
    %332 = vector.shape_cast %331 : vector<1x1x8x128xf32> to vector<8x128xf32>
    %333 = arith.mulf %332, %266 : vector<8x128xf32>
    %334 = arith.addf %267, %333 : vector<8x128xf32>
    %c32_i32_253 = arith.constant 32 : i32
    %335 = tpu.dynamic_rotate %266 by %c32_i32_253 dim 1 : vector<8x128xf32>, i32 -> vector<8x128xf32>
    %c3_254 = arith.constant 3 : index
    %c1_255 = arith.constant 1 : index
    %c0_256 = arith.constant 0 : index
    %c0_257 = arith.constant 0 : index
    %336 = vector.load %arg4[%c3_254, %c1_255, %c0_256, %c0_257] : memref<4x4x8x128xf32, #tpu.memory_space<vmem>>, vector<1x1x8x128xf32>
    %337 = vector.shape_cast %336 : vector<1x1x8x128xf32> to vector<8x128xf32>
    %338 = arith.mulf %337, %335 : vector<8x128xf32>
    %339 = arith.addf %334, %338 : vector<8x128xf32>
    %c64_i32_258 = arith.constant 64 : i32
    %340 = tpu.dynamic_rotate %266 by %c64_i32_258 dim 1 : vector<8x128xf32>, i32 -> vector<8x128xf32>
    %c3_259 = arith.constant 3 : index
    %c2_260 = arith.constant 2 : index
    %c0_261 = arith.constant 0 : index
    %c0_262 = arith.constant 0 : index
    %341 = vector.load %arg4[%c3_259, %c2_260, %c0_261, %c0_262] : memref<4x4x8x128xf32, #tpu.memory_space<vmem>>, vector<1x1x8x128xf32>
    %342 = vector.shape_cast %341 : vector<1x1x8x128xf32> to vector<8x128xf32>
    %343 = arith.mulf %342, %340 : vector<8x128xf32>
    %344 = arith.addf %339, %343 : vector<8x128xf32>
    %c96_i32_263 = arith.constant 96 : i32
    %345 = tpu.dynamic_rotate %266 by %c96_i32_263 dim 1 : vector<8x128xf32>, i32 -> vector<8x128xf32>
    %c3_264 = arith.constant 3 : index
    %c3_265 = arith.constant 3 : index
    %c0_266 = arith.constant 0 : index
    %c0_267 = arith.constant 0 : index
    %346 = vector.load %arg4[%c3_264, %c3_265, %c0_266, %c0_267] : memref<4x4x8x128xf32, #tpu.memory_space<vmem>>, vector<1x1x8x128xf32>
    %347 = vector.shape_cast %346 : vector<1x1x8x128xf32> to vector<8x128xf32>
    %348 = arith.mulf %347, %345 : vector<8x128xf32>
    %349 = arith.addf %344, %348 : vector<8x128xf32>
    %c0_268 = arith.constant 0 : index
    %c3_269 = arith.constant 3 : index
    %c0_270 = arith.constant 0 : index
    %c0_271 = arith.constant 0 : index
    %350 = vector.load %arg6[%c0_268, %c3_269, %c0_270, %c0_271] : memref<1x4x8x128xf32, #tpu.memory_space<vmem>>, vector<1x1x8x128xf32>
    %351 = vector.shape_cast %350 : vector<1x1x8x128xf32> to vector<8x128xf32>
    %352 = vector.shape_cast %349 : vector<8x128xf32> to vector<1x1x8x128xf32>
    tpu.vector_store %arg6[%c0_268, %c3_269, %c0_270, %c0_271], %352 {strides = array<i32>} : memref<1x4x8x128xf32, #tpu.memory_space<vmem>>, vector<1x1x8x128xf32>,
    return
  }
  func.func @transform_0(%arg0: i32) -> (i32, i32, i32, i32) {
    %c0_i32 = arith.constant 0 : i32
    %c0_i32_0 = arith.constant 0 : i32
    %c0_i32_1 = arith.constant 0 : i32
    %c0_i32_2 = arith.constant 0 : i32
    return %arg0, %c0_i32, %c0_i32_0, %c0_i32_1 : i32, i32, i32, i32
  }
  func.func @transform_1(%arg0: i32) -> (i32, i32, i32, i32, i32) {
    %c0_i32 = arith.constant 0 : i32
    %c0_i32_0 = arith.constant 0 : i32
    %c0_i32_1 = arith.constant 0 : i32
    %c0_i32_2 = arith.constant 0 : i32
    %c0_i32_3 = arith.constant 0 : i32
    %c0_i32_4 = arith.constant 0 : i32
    return %c0_i32, %c0_i32_0, %c0_i32_1, %c0_i32_2, %c0_i32_3 : i32, i32, i32, i32, i32
  }
  func.func @transform_2(%arg0: i32) -> (i32, i32) {
    %c0_i32 = arith.constant 0 : i32
    %c0_i32_0 = arith.constant 0 : i32
    %c0_i32_1 = arith.constant 0 : i32
    return %c0_i32, %c0_i32_0 : i32, i32
  }
  func.func @transform_3(%arg0: i32) -> (i32, i32, i32, i32) {
    %c0_i32 = arith.constant 0 : i32
    %c0_i32_0 = arith.constant 0 : i32
    %c0_i32_1 = arith.constant 0 : i32
    %c0_i32_2 = arith.constant 0 : i32
    %c0_i32_3 = arith.constant 0 : i32
    return %c0_i32, %c0_i32_0, %c0_i32_1, %c0_i32_2 : i32, i32, i32, i32
  }
  func.func @transform_4(%arg0: i32) -> (i32, i32) {
    %c0_i32 = arith.constant 0 : i32
    %c0_i32_0 = arith.constant 0 : i32
    %c0_i32_1 = arith.constant 0 : i32
    return %c0_i32, %c0_i32_0 : i32, i32
  }
  func.func @transform_5(%arg0: i32) -> (i32, i32, i32, i32) {
    %c0_i32 = arith.constant 0 : i32
    %c0_i32_0 = arith.constant 0 : i32
    %c0_i32_1 = arith.constant 0 : i32
    %c0_i32_2 = arith.constant 0 : i32
    return %arg0, %c0_i32, %c0_i32_0, %c0_i32_1 : i32, i32, i32, i32
  }
  func.func @transform_6(%arg0: i32) -> (i32, i32, i32, i32) {
    %c0_i32 = arith.constant 0 : i32
    %c0_i32_0 = arith.constant 0 : i32
    %c0_i32_1 = arith.constant 0 : i32
    %c0_i32_2 = arith.constant 0 : i32
    return %arg0, %c0_i32, %c0_i32_0, %c0_i32_1 : i32, i32, i32, i32
  }
}

</mosaic_0001>

<bundles_post_ra>
// kernel: tile.9
= control target key start
LH: loop header
LB: loop body
LE: loop exit
PB: predicated region body
PF: predicated region fallthrough
CT: control target
= control target key end

     0   :  { %vm162_vm0 = vcmask 1047556   ;;  %s398_s10 = smov 96   ;;  %vm164_vm1 = vcmask 261120   ;;  %s400_s21 = smov 32   ;;  %vm201_vm2 = vcmask 1048320   ;;  %vm244_vm3 = vcmask 785920   ;;  %s579_s0 = inlined_call_operand.vmem [shape: f32[2,2,8,4,32], index: 0, kind: input, shape index: {}]   ;;  %s580_s1 = inlined_call_operand.vmem [shape: f32[2,2,8,128], index: 1, kind: output, shape index: {}]  }
   0x1   :  { %v376_v0 = vld [vmem:[%s579_s0 + $0x1c] sm:$0xf]  ;;  %v377_v1 = vld [vmem:[%s579_s0 + $0x18] sm:$0xf]  ;;  %v378_v2 = vld [vmem:[%s579_s0 + $0x14] sm:$0xf] }
   0x2   :  { %128 = vst [vmem:[#allocation0 + $0x38] sm:$0xf] %v376_v0  ;;  %133 = vst [vmem:[#allocation0 + $0x30] sm:$0xf] %v377_v1  ;;  %v379_v3 = vld [vmem:[%s579_s0 + $0x10] sm:$0xf] }
   0x3   :  { %138 = vst [vmem:[#allocation0 + $0x28] sm:$0xf] %v378_v2  ;;  %v380_v4 = vld [vmem:[%s579_s0 + $0xc] sm:$0xf]  ;;  %v381_v5 = vld [vmem:[%s579_s0 + $0x8] sm:$0xf] }
   0x4   :  { %143 = vst [vmem:[#allocation0 + $0x20] sm:$0xf] %v379_v3  ;;  %148 = vst [vmem:[#allocation0 + $0x18] sm:$0xf] %v380_v4  ;;  %v382_v6 = vld [vmem:[%s579_s0 + $0x4] sm:$0xf] }
   0x5   :  { %153 = vst [vmem:[#allocation0 + $0x10] sm:$0xf] %v381_v5  ;;  %v158_v7 = vld [vmem:[%s579_s0] sm:$0xf]  ;;  %157 = vst [vmem:[#allocation0 + $0x8] sm:$0xf] %v382_v6 }
   0x6   :  { %159 = vst [vmem:[#allocation0] sm:$0xf] %v158_v7  ;;  %v360_v8 = vld [vmem:[%s579_s0 + $0x5c] sm:$0xf]  ;;  %v361_v9 = vld [vmem:[%s579_s0 + $0x58] sm:$0xf] }
   0x7   :  { %v362_v10 = vld [vmem:[%s579_s0 + $0x54] sm:$0xf]  ;;  %48 = vst [vmem:[#allocation0 + $0xb8] sm:$0xf] %v360_v8  ;;  %53 = vst [vmem:[#allocation0 + $0xb0] sm:$0xf] %v361_v9 }
   0x8   :  { %58 = vst [vmem:[#allocation0 + $0xa8] sm:$0xf] %v362_v10  ;;  %v363_v11 = vld [vmem:[%s579_s0 + $0x50] sm:$0xf]  ;;  %v364_v12 = vld [vmem:[%s579_s0 + $0x4c] sm:$0xf] }
   0x9   :  { %v365_v13 = vld [vmem:[%s579_s0 + $0x48] sm:$0xf]  ;;  %63 = vst [vmem:[#allocation0 + $0xa0] sm:$0xf] %v363_v11  ;;  %68 = vst [vmem:[#allocation0 + $0x98] sm:$0xf] %v364_v12 }
   0xa   :  { %73 = vst [vmem:[#allocation0 + $0x90] sm:$0xf] %v365_v13  ;;  %v366_v14 = vld [vmem:[%s579_s0 + $0x44] sm:$0xf]  ;;  %v367_v15 = vld [vmem:[%s579_s0 + $0x40] sm:$0xf] }
   0xb   :  { %v368_v16 = vld [vmem:[%s579_s0 + $0x3c] sm:$0xf]  ;;  %78 = vst [vmem:[#allocation0 + $0x88] sm:$0xf] %v366_v14  ;;  %83 = vst [vmem:[#allocation0 + $0x80] sm:$0xf] %v367_v15 }
   0xc   :  { %88 = vst [vmem:[#allocation0 + $0x78] sm:$0xf] %v368_v16  ;;  %v369_v17 = vld [vmem:[%s579_s0 + $0x38] sm:$0xf]  ;;  %v370_v18 = vld [vmem:[%s579_s0 + $0x34] sm:$0xf] }
   0xd   :  { %v371_v19 = vld [vmem:[%s579_s0 + $0x30] sm:$0xf]  ;;  %93 = vst [vmem:[#allocation0 + $0x70] sm:$0xf] %v369_v17  ;;  %98 = vst [vmem:[#allocation0 + $0x68] sm:$0xf] %v370_v18 }
   0xe   :  { %103 = vst [vmem:[#allocation0 + $0x60] sm:$0xf] %v371_v19  ;;  %v372_v20 = vld [vmem:[%s579_s0 + $0x2c] sm:$0xf]  ;;  %v373_v21 = vld [vmem:[%s579_s0 + $0x28] sm:$0xf] }
   0xf   :  { %v374_v22 = vld [vmem:[%s579_s0 + $0x24] sm:$0xf]  ;;  %108 = vst [vmem:[#allocation0 + $0x58] sm:$0xf] %v372_v20  ;;  %113 = vst [vmem:[#allocation0 + $0x50] sm:$0xf] %v373_v21 }
  0x10   :  { %118 = vst [vmem:[#allocation0 + $0x48] sm:$0xf] %v374_v22  ;;  %v375_v23 = vld [vmem:[%s579_s0 + $0x20] sm:$0xf]  ;;  %v352_v24 = vld [vmem:[%s579_s0 + $0x7c] sm:$0xf] }
  0x11   :  { %v353_v25 = vld [vmem:[%s579_s0 + $0x78] sm:$0xf]  ;;  %123 = vst [vmem:[#allocation0 + $0x40] sm:$0xf] %v375_v23  ;;  %8 = vst [vmem:[#allocation0 + $0xf8] sm:$0xf] %v352_v24 }
  0x12   :  { %v196_v26 = vld [vmem:[#allocation0 + $0x3] ss:$8 sm:$0xf0]   ;;  %13 = vst [vmem:[#allocation0 + $0xf0] sm:$0xf] %v353_v25  ;;  %vm287_vm4 = vcmask 523520  }
  0x13   :  { %v354_v27 = vld [vmem:[%s579_s0 + $0x74] sm:$0xf]  ;;  %v194_v28 = vld [vmem:[#allocation0 + $0x3] ss:$8 sm:$0xf]  }
  0x14   :  { %18 = vst [vmem:[#allocation0 + $0xe8] sm:$0xf] %v354_v27  ;;  %v355_v29 = vld [vmem:[%s579_s0 + $0x70] sm:$0xf]  ;;  %v198_v30 = vsel %vm162_vm0, %v196_v26, %v194_v28  ;;  %v356_v31 = vld [vmem:[%s579_s0 + $0x6c] sm:$0xf] }
  0x15   :  { %23 = vst [vmem:[#allocation0 + $0xe0] sm:$0xf] %v355_v29  ;;  %v357_v32 = vld [vmem:[%s579_s0 + $0x68] sm:$0xf]  ;;  %v358_v33 = vld [vmem:[%s579_s0 + $0x64] sm:$0xf]  ;;  %199 = vrot.lane.b32.xlu0 %v198_v30, %s398_s10 }
  0x16   :  { %v217_v34 = vld [vmem:[#allocation0 + $0x83] ss:$8 sm:$0xf0]   ;;  %28 = vst [vmem:[#allocation0 + $0xd8] sm:$0xf] %v356_v31 }
  0x17   :  { %33 = vst [vmem:[#allocation0 + $0xd0] sm:$0xf] %v357_v32  ;;  %38 = vst [vmem:[#allocation0 + $0xc8] sm:$0xf] %v358_v33  ;;  %v359_v35 = vld [vmem:[%s579_s0 + $0x60] sm:$0xf] }
  0x18   :  { %v215_v36 = vld [vmem:[#allocation0 + $0x83] ss:$8 sm:$0xf]   ;;  %43 = vst [vmem:[#allocation0 + $0xc0] sm:$0xf] %v359_v35  ;;  %s399_s0 = smov 64  }
  0x19   :  { %v219_v37 = vsel %vm162_vm0, %v217_v34, %v215_v36  ;;  %v206_v38 = vld [vmem:[#allocation0 + $0x43] ss:$8 sm:$0xf0]   ;;  %v237_v39 = vld [vmem:[#allocation0 + $0x2] ss:$8 sm:$0xf]  }
  0x1a   :  { %220 = vrot.lane.b32.xlu1 %v219_v37, %s398_s10  ;;  %v204_v40 = vld [vmem:[#allocation0 + $0x43] ss:$8 sm:$0xf]   ;;  %v239_v41 = vld [vmem:[#allocation0 + $0x2] ss:$8 sm:$0xf0]  }
  0x1b   :  { %v208_v42 = vsel %vm162_vm0, %v206_v38, %v204_v40  ;;  %v249_v44 = vld [vmem:[#allocation0 + $0x42] ss:$8 sm:$0xf0]   ;;  %v241_v45 = vsel %vm162_vm0, %v239_v41, %v237_v39  ;;  %v280_v52 = vld [vmem:[#allocation0 + $0x1] ss:$8 sm:$0xf]  }
  0x1c   :  { %209 = vrot.lane.b32.xlu0 %v208_v42, %s398_s10  ;;  %v228_v43 = vld [vmem:[#allocation0 + $0xc3] ss:$8 sm:$0xf0]   ;;  %v247_v46 = vld [vmem:[#allocation0 + $0x42] ss:$8 sm:$0xf]  }
  0x1d   :  { %v258_v47 = vld [vmem:[#allocation0 + $0x82] ss:$8 sm:$0xf]   ;;  %v251_v53 = vsel %vm162_vm0, %v249_v44, %v247_v46  ;;  %v282_v55 = vld [vmem:[#allocation0 + $0x1] ss:$8 sm:$0xf0]  }
  0x1e   :  { %v260_v49 = vld [vmem:[#allocation0 + $0x82] ss:$8 sm:$0xf0]   ;;  %v160_v56 = vld [vmem:[#allocation0] ss:$8 sm:$0xf]   ;;  %v284_v4 = vsel %vm162_vm0, %v282_v55, %v280_v52 }
  0x1f   :  { %v226_v48 = vld [vmem:[#allocation0 + $0xc3] ss:$8 sm:$0xf]   ;;  %v271_v51 = vld [vmem:[#allocation0 + $0xc2] ss:$8 sm:$0xf0]   ;;  %v262_v54 = vsel %vm162_vm0, %v260_v49, %v258_v47 }
  0x20   :  { %v230_v50 = vsel %vm162_vm0, %v228_v43, %v226_v48  ;;  %242 = vrot.lane.b32.xlu0 %v241_v45, %s399_s0  ;;  %v269_v57 = vld [vmem:[#allocation0 + $0xc2] ss:$8 sm:$0xf]   ;;  %v161_v58 = vld [vmem:[#allocation0] ss:$8 sm:$0xf0]  }
  0x21   :  { %231 = vrot.lane.b32.xlu1 %v230_v50, %s398_s10  ;;  %v163_v59 = vsel %vm162_vm0, %v161_v58, %v160_v56  ;;  %v176_v60 = vld [vmem:[#allocation0 + $0x80] ss:$8 sm:$0xf]   ;;  %v290_v62 = vld [vmem:[#allocation0 + $0x41] ss:$8 sm:$0xf]   ;;  %v273_v3 = vsel %vm162_vm0, %v271_v51, %v269_v57 }
  0x22   :  { %v178_v61 = vld [vmem:[#allocation0 + $0x80] ss:$8 sm:$0xf0]   ;;  %v292_v63 = vld [vmem:[#allocation0 + $0x41] ss:$8 sm:$0xf0]  }
  0x23   :  { %165 = vst.msk [vmem:[%s580_s1] sm:$0xff] %vm164_vm1, %v163_v59   ;;  %v180_v0 = vsel %vm162_vm0, %v178_v61, %v176_v60  ;;  %v167_v1 = vld [vmem:[#allocation0 + $0x40] ss:$8 sm:$0xf]   ;;  %v294_v11 = vsel %vm162_vm0, %v292_v63, %v290_v62 }
  0x24   :  { %263 = vrot.lane.b32.xlu0 %v262_v54, %s399_s0  ;;  %v169_v2 = vld [vmem:[#allocation0 + $0x40] ss:$8 sm:$0xf0]   ;;  %384 = vst.msk [vmem:[%s580_s1 + $0x10] sm:$0xff] %vm164_vm1, %v180_v0  }
  0x25   :  { %252 = vrot.lane.b32.xlu1 %v251_v53, %s399_s0  ;;  %v171_v5 = vsel %vm162_vm0, %v169_v2, %v167_v1  ;;  %v185_v6 = vld [vmem:[#allocation0 + $0xc0] ss:$8 sm:$0xf]   ;;  %v301_v8 = vld [vmem:[#allocation0 + $0x81] ss:$8 sm:$0xf]  }
  0x26   :  { %v187_v7 = vld [vmem:[#allocation0 + $0xc0] ss:$8 sm:$0xf0]   ;;  %v303_v9 = vld [vmem:[#allocation0 + $0x81] ss:$8 sm:$0xf0]  }
  0x27   :  { %383 = vst.msk [vmem:[%s580_s1 + $0x8] sm:$0xff] %vm164_vm1, %v171_v5   ;;  %v189_v10 = vsel %vm162_vm0, %v187_v7, %v185_v6  ;;  %v305_v12 = vsel %vm162_vm0, %v303_v9, %v301_v8  ;;  %v312_v13 = vld [vmem:[#allocation0 + $0xc1] ss:$8 sm:$0xf]  }
  0x28   :  { %385 = vst.msk [vmem:[%s580_s1 + $0x18] sm:$0xff] %vm164_vm1, %v189_v10   ;;  %285 = vrot.lane.b32.xlu0 %v284_v4, %s400_s21  ;;  %v314_v14 = vld [vmem:[#allocation0 + $0xc1] ss:$8 sm:$0xf0]  }
  0x29   :  { %274 = vrot.lane.b32.xlu1 %v273_v3, %s399_s0  ;;  %v316_v15 = vsel %vm162_vm0, %v314_v14, %v312_v13 }
  0x2c   :  { %306 = vrot.lane.b32.xlu0 %v305_v12, %s400_s21 }
  0x2d   :  { %295 = vrot.lane.b32.xlu1 %v294_v11, %s400_s21 }
  0x31   :  { %317 = vrot.lane.b32.xlu1 %v316_v15, %s400_s21 }
  0x87   :  { %v200_v16 = vpop.permute.xlu0 %199  }
  0x88   :  { %202 = vst.msk [vmem:[%s580_s1] sm:$0xff] %vm201_vm2, %v200_v16  }
  0x8c   :  { %v221_v17 = vpop.permute.xlu1 %220  }
  0x8d   :  { %387 = vst.msk [vmem:[%s580_s1 + $0x10] sm:$0xff] %vm201_vm2, %v221_v17  }
  0x8e   :  { %v210_v18 = vpop.permute.xlu0 %209  }
  0x8f   :  { %386 = vst.msk [vmem:[%s580_s1 + $0x8] sm:$0xff] %vm201_vm2, %v210_v18  }
  0x92   :  { %v243_v20 = vpop.permute.xlu0 %242  }
  0x93   :  { %v232_v19 = vpop.permute.xlu1 %231   ;;  %245 = vst.msk [vmem:[%s580_s1] sm:$0xff] %vm244_vm3, %v243_v20  }
  0x94   :  { %388 = vst.msk [vmem:[%s580_s1 + $0x18] sm:$0xff] %vm201_vm2, %v232_v19  }
  0x96   :  { %v264_v22 = vpop.permute.xlu0 %263  }
  0x97   :  { %v253_v21 = vpop.permute.xlu1 %252   ;;  %390 = vst.msk [vmem:[%s580_s1 + $0x10] sm:$0xff] %vm244_vm3, %v264_v22  }
  0x98   :  { %389 = vst.msk [vmem:[%s580_s1 + $0x8] sm:$0xff] %vm244_vm3, %v253_v21  }
  0x9a   :  { %v286_v24 = vpop.permute.xlu0 %285  }
  0x9b   :  { %v275_v23 = vpop.permute.xlu1 %274   ;;  %288 = vst.msk [vmem:[%s580_s1] sm:$0xff] %vm287_vm4, %v286_v24  }
  0x9c   :  { %391 = vst.msk [vmem:[%s580_s1 + $0x18] sm:$0xff] %vm244_vm3, %v275_v23  }
  0x9e   :  { %v307_v26 = vpop.permute.xlu0 %306  }
  0x9f   :  { %v296_v25 = vpop.permute.xlu1 %295   ;;  %393 = vst.msk [vmem:[%s580_s1 + $0x10] sm:$0xff] %vm287_vm4, %v307_v26  }
  0xa0   :  { %392 = vst.msk [vmem:[%s580_s1 + $0x8] sm:$0xff] %vm287_vm4, %v296_v25  }
  0xa3   :  { %v318_v27 = vpop.permute.xlu1 %317  }
  0xa4   :  { %394 = vst.msk [vmem:[%s580_s1 + $0x18] sm:$0xff] %vm287_vm4, %v318_v27  }

// kernel: model_forward.1
= control target key start
LH: loop header
LB: loop body
LE: loop exit
PB: predicated region body
PF: predicated region fallthrough
CT: control target
= control target key end

     0   :  { %s795_s21 = smov 0   ;;  %s967_s0 = inlined_call_operand.vmem [shape: f32[2,2,8,128], index: 0, kind: input, shape index: {}]   ;;  %s968_s1 = inlined_call_operand.vmem [shape: f32[3,2,3,8,128], index: 1, kind: input, shape index: {}]   ;;  %s969_s2 = inlined_call_operand.vmem [shape: f32[8,128], index: 2, kind: input, shape index: {}]   ;;  %s970_s3 = inlined_call_operand.vmem [shape: f32[4,4,8,128], index: 3, kind: input, shape index: {}]   ;;  %s971_s4 = inlined_call_operand.vmem [shape: f32[8,128], index: 4, kind: input, shape index: {}]   ;;  %s972_s5 = inlined_call_operand.vmem [shape: f32[2,4,8,128], index: 5, kind: output, shape index: {0}]   ;;  %s973_s6 = inlined_call_operand.vmem [shape: f32[2,4,9,128], index: 6, kind: output, shape index: {1}]  }
   0x1 LB: > { %s658_s22 = sadd.s32 4294967295, %s750_s21   ;;  %p662_p0 = scmp.ge.s32.totalorder %s750_s21, 1  ;;  %s750_s21 = sphi %s795_s21, %s17_s21  }
   0x2   : > { %p215_p1 = scmp.lt.s32.totalorder %s750_s21, 3 }
   0x4   : > { %p216_p2 = pnand %p662_p0, %p215_p1 }
   0x5   : > { %p250_p3 = scmp.lt.s32.totalorder (!%p216_p2), %s658_s22, 1  ;;  %v752_v1 = vmov (!%p216_p2), 0.0   ;;  %s753_s7 = smov (!%p216_p2), 1   ;;  %v276_v3 = vld [vmem:[%s968_s1] sm:$0xff] (!%p216_p2)  ;;  %v670_v4 = vld [vmem:[%s968_s1 + $0x8] sm:$0xff] (!%p216_p2)  ;;  %v675_v5 = vld [vmem:[%s968_s1 + $0x30] sm:$0xff] (!%p216_p2) }
   0x6   : > { %219 = sbr.rel (%p216_p2) target bundleno = 401 (0x191), region = 40  ;;  %s754_s8 = smov (!%p216_p2), 2   ;;  %v676_v6 = vld [vmem:[%s968_s1 + $0x38] sm:$0xff] (!%p216_p2)  ;;  %v681_v7 = vld [vmem:[%s968_s1 + $0x60] sm:$0xff] (!%p216_p2)  ;;  %v682_v8 = vld [vmem:[%s968_s1 + $0x68] sm:$0xff] (!%p216_p2)  ;;  %vm348_vm0 = vcmask (!%p216_p2), 1040384  }
   0x7   : > { %v672_v12 = vld [vmem:[%s968_s1 + $0x18] sm:$0xff] (!%p216_p2)  ;;  %v678_v18 = vld [vmem:[%s968_s1 + $0x48] sm:$0xff] (!%p216_p2)  ;;  %v671_v20 = vld [vmem:[%s968_s1 + $0x10] sm:$0xff] (!%p216_p2)  ;;  %s755_s28 = smov (!%p216_p2), 15   ;;  %vm476_vm1 = vcmask (!%p216_p2), 1046528   ;;  %s757_s29 = smov (!%p216_p2), 64  }
   0x8   : > { %v684_v19 = vld [vmem:[%s968_s1 + $0x78] sm:$0xff] (!%p216_p2)  ;;  %v677_v21 = vld [vmem:[%s968_s1 + $0x40] sm:$0xff] (!%p216_p2)  ;;  %v683_v22 = vld [vmem:[%s968_s1 + $0x70] sm:$0xff] (!%p216_p2) }
   0x9   : > { %v679_v33 = vld [vmem:[%s968_s1 + $0x50] sm:$0xff] (!%p216_p2)  ;;  %v685_v34 = vld [vmem:[%s968_s1 + $0x80] sm:$0xff] (!%p216_p2)  ;;  %v680_v35 = vld [vmem:[%s968_s1 + $0x58] sm:$0xff] (!%p216_p2) }
   0xa   : > { %v686_v37 = vld [vmem:[%s968_s1 + $0x88] sm:$0xff] (!%p216_p2)  ;;  %v673_v41 = vld [vmem:[%s968_s1 + $0x20] sm:$0xff] (!%p216_p2) }
   0xb   : > { %v344_v44 = vld [vmem:[%s969_s2] sm:$0xff] (!%p216_p2)  ;;  %v674_v49 = vld [vmem:[%s968_s1 + $0x28] sm:$0xff] (!%p216_p2) }
   0xc   : > { %v353_v54 = vrot.slane (!%p216_p2), %v344_v44, 1 }
   0xd   : > { %s975_s22 = smov (!%p250_p3, %s658_s22), 1 }
   0xe   : > { %s713_s23 = sshll.u32 %s975_s22, 4  ;;  %s715_s24 = sshll.u32 %s975_s22, 6 }
   0xf   : > { %s254_s27 = scalar_lea.vmem %s967_s0, %s713_s23  ;;  %s813_s30 = scalar_lea.vmem %s973_s6, %s715_s24 }
  0x10   : > { %v265_v0 = vld [vmem:[%s254_s27] sm:$0xff]  ;;  %688 = vst [vmem:[%s813_s30 + $0x18] sm:$0x1] %v752_v1  ;;  %692 = vst [vmem:[%s813_s30 + $0x38] sm:$0x1] %v752_v1  ;;  %v669_v2 = vld [vmem:[%s254_s27 + $0x8] sm:$0xff] }
  0x11   : > { %266 = vrot.lane.b32.xlu0 %v265_v0, %s753_s7  ;;  %272 = vrot.lane.b32.xlu1 %v669_v2, %s753_s7  ;;  %v277_v10 = vmul.f32 %v276_v3, %v265_v0  ;;  %v300_v11 = vmul.f32 %v675_v5, %v265_v0  ;;  %v323_v16 = vmul.f32 %v681_v7, %v265_v0  ;;  %s758_s7 = smov 32  }
  0x12   : > { %v288_v23 = vmul.f32 %v672_v12, %v669_v2  ;;  %v311_v27 = vmul.f32 %v678_v18, %v669_v2  ;;  %v334_v28 = vmul.f32 %v684_v19, %v669_v2 }
  0x15   : > { %268 = vrot.lane.b32.xlu0 %v265_v0, %s754_s8  ;;  %274 = vrot.lane.b32.xlu1 %v669_v2, %s754_s8  ;;  %s714_s8 = sshll.u32 %s975_s22, 5 }
  0x16   : > { %s259_s13 = scalar_lea.vmem %s972_s5, %s714_s8 }
  0x83   : > { %v267_v9 = vpop.permute.xlu0 %266  ;;  %v273_v13 = vpop.permute.xlu1 %272 }
  0x84   : > { %v280_v14 = vmul.f32 %v670_v4, %v267_v9  ;;  %v303_v15 = vmul.f32 %v676_v6, %v267_v9  ;;  %v326_v17 = vmul.f32 %v682_v8, %v267_v9  ;;  %v315_v42 = vmul.f32 %v679_v33, %v273_v13 }
  0x85   : > { %v338_v43 = vmul.f32 %v685_v34, %v273_v13  ;;  %v292_v51 = vmul.f32 %v673_v41, %v273_v13 }
  0x86   : > { %v281_v24 = vadd.f32 %v280_v14, %v277_v10  ;;  %v304_v25 = vadd.f32 %v303_v15, %v300_v11  ;;  %v327_v29 = vadd.f32 %v326_v17, %v323_v16 }
  0x87   : > { %v269_v26 = vpop.permute.xlu0 %268  ;;  %v275_v36 = vpop.permute.xlu1 %274 }
  0x88   : > { %v284_v30 = vmul.f32 %v671_v20, %v269_v26  ;;  %v307_v31 = vmul.f32 %v677_v21, %v269_v26  ;;  %v330_v32 = vmul.f32 %v683_v22, %v269_v26  ;;  %v319_v45 = vmul.f32 %v680_v35, %v275_v36 }
  0x89   : > { %v342_v50 = vmul.f32 %v686_v37, %v275_v36  ;;  %v296_v56 = vmul.f32 %v674_v49, %v275_v36 }
  0x8a   : > { %v285_v38 = vadd.f32 %v284_v30, %v281_v24  ;;  %v308_v39 = vadd.f32 %v307_v31, %v304_v25  ;;  %v331_v40 = vadd.f32 %v330_v32, %v327_v29 }
  0x8c   : > { %v289_v46 = vadd.f32 %v288_v23, %v285_v38  ;;  %v312_v47 = vadd.f32 %v311_v27, %v308_v39  ;;  %v335_v48 = vadd.f32 %v334_v28, %v331_v40 }
  0x8e   : > { %v316_v52 = vadd.f32 %v315_v42, %v312_v47  ;;  %v339_v53 = vadd.f32 %v338_v43, %v335_v48  ;;  %v293_v55 = vadd.f32 %v292_v51, %v289_v46 }
  0x90   : > { %v320_v57 = vadd.f32 %v319_v45, %v316_v52  ;;  %v343_v58 = vadd.f32 %v342_v50, %v339_v53  ;;  %v297_v62 = vadd.f32 %v296_v56, %v293_v55 }
  0x92   : > { %v346_v59 = vrot.slane %v343_v58, 7  ;;  %v874_v60 = vadd.f32 %v344_v44, %v320_v57  ;;  %v355_v61 = vadd.f32 %v353_v54, %v343_v58 }
  0x94   : > { %v349_v63 = vsel %vm348_vm0, 0.0, %v346_v59  ;;  %470 = vrot.lane.b32.xlu1 %v874_v60, %s755_s28  ;;  %v363_v0 = vmul.f32 0.5, %v874_v60  ;;  %v879_v1 = vmul.f32 0.70710677, %v874_v60  ;;  %v360_v2 = vmul.f32 0.5, %v355_v61 }
  0x95   : > { %v350_v3 = vadd.f32 %v349_v63, %v297_v62  ;;  %v881_v4 = vmul.f32 0.70710677, %v355_v61 }
  0x96   : > { %v364_v5 = vadd.f32 1.0, %v363_v0  ;;  %v424_v6 = vand.u32 2147483647, %v879_v1  ;;  %v361_v7 = vadd.f32 1.0, %v360_v2  ;;  %vm440_vm2 = vcmp.ge.f32.partialorder %v879_v1, 0.0 }
  0x97   : > { %v884_v8 = vadd.f32 %v350_v3, %v344_v44  ;;  %v397_v9 = vand.u32 2147483647, %v881_v4  ;;  %vm413_vm3 = vcmp.ge.f32.partialorder %v881_v4, 0.0 }
  0x98   : > { %687 = vst [vmem:[%s813_s30 + $0x10] sm:$0xff] %v364_v5  ;;  %v425_v10 = vmul.f32 0.3275911, %v424_v6  ;;  %362 = vst [vmem:[%s813_s30 + $0x1] sm:$0x80] %v361_v7  ;;  %v442_v25 = vsub.f32 0.0, %v424_v6 }
  0x99   : > { %v357_v11 = vmul.f32 0.5, %v884_v8  ;;  %467 = vrot.lane.b32.xlu0 %v884_v8, %s755_s28  ;;  %v398_v12 = vmul.f32 0.3275911, %v397_v9  ;;  %v474_v13 = vrot.slane %v884_v8, 1  ;;  %v893_v15 = vmul.f32 0.70710677, %v884_v8 }
  0x9a   : > { %v426_v14 = vadd.f32 1.0, %v425_v10  ;;  %v415_v28 = vsub.f32 0.0, %v397_v9  ;;  %v443_v32 = vmul.f32 %v442_v25, %v424_v6 }
  0x9b   : > { %v358_v16 = vadd.f32 1.0, %v357_v11  ;;  %v399_v17 = vadd.f32 1.0, %v398_v12  ;;  %v895_v18 = vsel %vm476_vm1, %v474_v13, %v355_v61  ;;  %v369_v19 = vand.u32 2147483647, %v893_v15 }
  0x9c   : > { %732 = vrcp.f32 %v426_v14  ;;  %v416_v34 = vmul.f32 %v415_v28, %v397_v9  ;;  %v444_v41 = vmul.f32 1.442695, %v443_v32  ;;  %vm385_vm4 = vcmp.ge.f32.partialorder %v893_v15, 0.0 }
  0x9d   : > { %359 = vst [vmem:[%s813_s30] sm:$0xff] %v358_v16  ;;  %734 = vrcp.f32 %v399_v17  ;;  %478 = vrot.lane.b32.xlu0 %v895_v18, %s755_s28  ;;  %v370_v20 = vmul.f32 0.3275911, %v369_v19  ;;  %v387_v38 = vsub.f32 0.0, %v369_v19  ;;  %v756_v16 = vmov -1.0  }
  0x9e   : > { %v417_v43 = vmul.f32 1.442695, %v416_v34  ;;  %v386_v25 = vsel %vm385_vm4, 1.0, %v756_v16 }
  0x9f   : > { %v371_v21 = vadd.f32 1.0, %v370_v20  ;;  %v388_v47 = vmul.f32 %v387_v38, %v369_v19  ;;  %v414_v19 = vsel %vm413_vm3, 1.0, %v756_v16 }
  0xa1   : > { %736 = vrcp.f32 %v371_v21  ;;  %v389_v54 = vmul.f32 1.442695, %v388_v47  ;;  %v706_v47 = vld [vmem:[%s970_s3 + $0x60] sm:$0xff] }
  0xa2   : > { %738 = vpow2.f32 %v444_v41  ;;  %v481_v41 = vld [vmem:[%s971_s4] sm:$0xff] }
  0xa3   : > { %740 = vpow2.f32 %v417_v43 }
  0xa4   : > { %742 = vpow2.f32 %v389_v54 }
  0xa6   : > { %v733_v22 = vpop.eup %732 }
  0xa7   : > { %v735_v23 = vpop.eup %734  ;;  %v428_v24 = vmul.f32 %v733_v22, %v426_v14 }
  0xa8   : > { %v401_v26 = vmul.f32 %v735_v23, %v399_v17  ;;  %v441_v17 = vsel %vm440_vm2, 1.0, %v756_v16 }
  0xa9   : > { %v429_v27 = vsub.f32 2.0, %v428_v24 }
  0xaa   : > { %v402_v29 = vsub.f32 2.0, %v401_v26  ;;  %v452_v26 = vlaneseq }
  0xab   : > { %v430_v30 = vmul.f32 %v733_v22, %v429_v27  ;;  %v737_v31 = vpop.eup %736 }
  0xac   : > { %v403_v33 = vmul.f32 %v735_v23, %v402_v29  ;;  %v373_v36 = vmul.f32 %v737_v31, %v371_v21  ;;  %v739_v5 = vpop.eup %738  ;;  %v453_v27 = vand.u32 127, %v452_v26 }
  0xad   : > { %v431_v35 = vmul.f32 1.0614054, %v430_v30  ;;  %v741_v7 = vpop.eup %740 }
  0xae   : > { %v404_v37 = vmul.f32 1.0614054, %v403_v33  ;;  %v374_v40 = vsub.f32 2.0, %v373_v36  ;;  %v743_v22 = vpop.eup %742  ;;  %v458_v28 = vand.u32 31, %v453_v27 }
  0xaf   : > { %v432_v39 = vadd.f32 -1.4531521, %v431_v35 }
  0xb0   : > { %v405_v42 = vadd.f32 -1.4531521, %v404_v37  ;;  %v375_v45 = vmul.f32 %v737_v31, %v374_v40  ;;  %vm466_vm5 = vcmp.lt.s32.totalorder %v458_v28, 16  ;;  %v698_v37 = vld [vmem:[%s970_s3 + $0x28] sm:$0xff] }
  0xb1   : > { %v433_v44 = vmul.f32 %v432_v39, %v430_v30  ;;  %v699_v39 = vld [vmem:[%s970_s3 + $0x48] sm:$0xff] }
  0xb2   : > { %v406_v46 = vmul.f32 %v405_v42, %v403_v33  ;;  %v376_v49 = vmul.f32 1.0614054, %v375_v45  ;;  %v693_v40 = vld [vmem:[%s970_s3 + $0x8] sm:$0xff] }
  0xb3   : > { %v434_v48 = vadd.f32 1.4214138, %v433_v44 }
  0xb4   : > { %v407_v50 = vadd.f32 1.4214138, %v406_v46  ;;  %v377_v52 = vadd.f32 -1.4531521, %v376_v49 }
  0xb5   : > { %v435_v51 = vmul.f32 %v434_v48, %v430_v30 }
  0xb6   : > { %v408_v53 = vmul.f32 %v407_v50, %v403_v33  ;;  %v378_v56 = vmul.f32 %v377_v52, %v375_v45  ;;  %v695_v52 = vld [vmem:[%s970_s3 + $0x18] sm:$0xff] }
  0xb7   : > { %v436_v55 = vadd.f32 -0.28449672, %v435_v51 }
  0xb8   : > { %v409_v57 = vadd.f32 -0.28449672, %v408_v53  ;;  %v379_v59 = vadd.f32 1.4214138, %v378_v56  ;;  %v700_v53 = vld [vmem:[%s970_s3 + $0x30] sm:$0xff] }
  0xb9   : > { %v437_v58 = vmul.f32 %v436_v55, %v430_v30 }
  0xba   : > { %v410_v61 = vmul.f32 %v409_v57, %v403_v33  ;;  %v380_v63 = vmul.f32 %v379_v59, %v375_v45 }
  0xbb   : > { %v438_v62 = vadd.f32 0.2548296, %v437_v58  ;;  %v701_v58 = vld [vmem:[%s970_s3 + $0x50] sm:$0xff] }
  0xbc   : > { %v411_v0 = vadd.f32 0.2548296, %v410_v61  ;;  %v381_v3 = vadd.f32 -0.28449672, %v380_v63 }
  0xbd   : > { %v439_v2 = vmul.f32 %v438_v62, %v430_v30 }
  0xbe   : > { %v412_v6 = vmul.f32 %v411_v0, %v403_v33  ;;  %v382_v10 = vmul.f32 %v381_v3, %v375_v45 }
  0xbf   : > { %v446_v9 = vmul.f32 %v739_v5, %v439_v2  ;;  %v707_v5 = vld [vmem:[%s970_s3 + $0x68] sm:$0xff] }
  0xc0   : > { %v419_v11 = vmul.f32 %v741_v7, %v412_v6  ;;  %v383_v13 = vadd.f32 0.2548296, %v382_v10  ;;  %v702_v6 = vld [vmem:[%s970_s3 + $0x38] sm:$0xff] }
  0xc1   : > { %v447_v12 = vsub.f32 1.0, %v446_v9  ;;  %v703_v7 = vld [vmem:[%s970_s3 + $0x58] sm:$0xff] }
  0xc2   : > { %v420_v14 = vsub.f32 1.0, %v419_v11  ;;  %v384_v21 = vmul.f32 %v383_v13, %v375_v45  ;;  %v694_v45 = vld [vmem:[%s970_s3 + $0x10] sm:$0xff] }
  0xc3   : > { %v448_v20 = vmul.f32 %v447_v12, %v441_v17  ;;  %v708_v11 = vld [vmem:[%s970_s3 + $0x70] sm:$0xff] }
  0xc4   : > { %v421_v23 = vmul.f32 %v420_v14, %v414_v19  ;;  %v391_v1 = vmul.f32 %v743_v22, %v384_v21  ;;  %v709_v22 = vld [vmem:[%s970_s3 + $0x78] sm:$0xff] }
  0xc5   : > { %691 = vst [vmem:[%s813_s30 + $0x30] sm:$0xff] %v448_v20 }
  0xc6   : > { %690 = vst [vmem:[%s813_s30 + $0x21] sm:$0x80] %v421_v23  ;;  %v392_v24 = vsub.f32 1.0, %v391_v1 }
  0xc8   : > { %v393_v4 = vmul.f32 %v392_v24, %v386_v25 }
  0xca   : > { %689 = vst [vmem:[%s813_s30 + $0x20] sm:$0xff] %v393_v4  ;;  %s759_s30 = smov 96  }
 0x106   : > { %v471_v29 = vpop.permute.xlu1 %470 }
 0x107   : > { %v472_v30 = vsel %vm466_vm5, %v874_v60, %v471_v29  ;;  %v482_v60 = vld [vmem:[%s970_s3] sm:$0xff] }
 0x108   : > { %522 = vrot.lane.b32.xlu1 %v472_v30, %s757_s29  ;;  %512 = vrot.lane.b32.xlu0 %v472_v30, %s758_s7 }
 0x10b   : > { %v468_v31 = vpop.permute.xlu0 %467 }
 0x10c   : > { %v469_v15 = vsel %vm466_vm5, %v884_v8, %v468_v31  ;;  %v696_v8 = vld [vmem:[%s970_s3 + $0x20] sm:$0xff] }
 0x10d   : > { %485 = vrot.lane.b32.xlu1 %v469_v15, %s758_s7  ;;  %491 = vrot.lane.b32.xlu0 %v469_v15, %s757_s29  ;;  %v483_v36 = vmul.f32 %v482_v60, %v469_v15  ;;  %v506_v38 = vmul.f32 %v696_v8, %v472_v30 }
 0x10f   : > { %v479_v32 = vpop.permute.xlu0 %478  ;;  %v484_v49 = vadd.f32 %v483_v36, %v481_v41  ;;  %v507_v51 = vadd.f32 %v506_v38, %v481_v41 }
 0x110   : > { %v480_v33 = vsel %vm466_vm5, %v895_v18, %v479_v32  ;;  %v697_v18 = vld [vmem:[%s970_s3 + $0x40] sm:$0xff] }
 0x111   : > { %497 = vrot.lane.b32.xlu1 %v469_v15, %s759_s30  ;;  %556 = vrot.lane.b32.xlu0 %v480_v33, %s757_s29  ;;  %v510_v42 = vmul.f32 %v697_v18, %v472_v30  ;;  %v548_v57 = vmul.f32 %v706_v47, %v480_v33 }
 0x113   : > { %v511_v54 = vadd.f32 %v510_v42, %v481_v41  ;;  %v549_v13 = vadd.f32 %v548_v57, %v481_v41 }
 0x115   : > { %532 = vrot.lane.b32.xlu0 %v472_v30, %s759_s30  ;;  %550 = vrot.lane.b32.xlu1 %v480_v33, %s758_s7 }
 0x119   : > { %562 = vrot.lane.b32.xlu1 %v480_v33, %s759_s30 }
 0x17a   : > { %v523_v34 = vpop.permute.xlu1 %522  ;;  %v513_v35 = vpop.permute.xlu0 %512 }
 0x17b   : > { %v516_v43 = vmul.f32 %v698_v37, %v513_v35  ;;  %v520_v48 = vmul.f32 %v699_v39, %v513_v35  ;;  %v526_v3 = vmul.f32 %v700_v53, %v523_v34  ;;  %v530_v9 = vmul.f32 %v701_v58, %v523_v34 }
 0x17d   : > { %v517_v59 = vadd.f32 %v516_v43, %v507_v51  ;;  %v521_v63 = vadd.f32 %v520_v48, %v511_v54 }
 0x17f   : > { %v486_v44 = vpop.permute.xlu1 %485  ;;  %v492_v46 = vpop.permute.xlu0 %491  ;;  %v527_v14 = vadd.f32 %v526_v3, %v517_v59  ;;  %v531_v19 = vadd.f32 %v530_v9, %v521_v63 }
 0x180   : > { %v489_v50 = vmul.f32 %v693_v40, %v486_v44  ;;  %v495_v56 = vmul.f32 %v694_v45, %v492_v46 }
 0x182   : > { %v490_v55 = vadd.f32 %v489_v50, %v484_v49 }
 0x183   : > { %v498_v61 = vpop.permute.xlu1 %497  ;;  %v557_v62 = vpop.permute.xlu0 %556 }
 0x184   : > { %v496_v0 = vadd.f32 %v495_v56, %v490_v55  ;;  %v501_v2 = vmul.f32 %v695_v52, %v498_v61  ;;  %v560_v23 = vmul.f32 %v708_v11, %v557_v62 }
 0x186   : > { %v502_v10 = vadd.f32 %v501_v2, %v496_v0 }
 0x187   : > { %v551_v12 = vpop.permute.xlu1 %550  ;;  %v533_v16 = vpop.permute.xlu0 %532 }
 0x188   : > { %503 = vst [vmem:[%s259_s13] sm:$0xff] %v502_v10  ;;  %v554_v17 = vmul.f32 %v707_v5, %v551_v12  ;;  %v536_v20 = vmul.f32 %v702_v6, %v533_v16  ;;  %v540_v21 = vmul.f32 %v703_v7, %v533_v16 }
 0x18a   : > { %v555_v1 = vadd.f32 %v554_v17, %v549_v13  ;;  %v537_v24 = vadd.f32 %v536_v20, %v527_v14  ;;  %v541_v25 = vadd.f32 %v540_v21, %v531_v19 }
 0x18b   : > { %v563_v4 = vpop.permute.xlu1 %562 }
 0x18c   : > { %704 = vst [vmem:[%s259_s13 + $0x8] sm:$0xff] %v537_v24  ;;  %705 = vst [vmem:[%s259_s13 + $0x10] sm:$0xff] %v541_v25  ;;  %v561_v26 = vadd.f32 %v560_v23, %v555_v1  ;;  %v566_v27 = vmul.f32 %v709_v22, %v563_v4 }
 0x18e   : > { %v567_v28 = vadd.f32 %v566_v27, %v561_v26 }
 0x190   : > { %710 = vst [vmem:[%s259_s13 + $0x18] sm:$0xff] %v567_v28 }
 0x191 PF: > { %s17_s21 = sadd.s32 1, %s750_s21  }
 0x192   : > { %p14_p4 = scmp.ge.s32.totalorder %s17_s21, 4  }
 0x194   :  { %16 = sbr.rel (!%p14_p4) target bundleno = 1 (0x1), region = 121 }

</bundles_post_ra>
